<compile_context>
chip_gen: v6e
topology: v6e:2x2x1
jax: 0.10.0
libtpu: 0.0.40
codegen_flags: <defaults>
</compile_context>

<pallas_src>
import functools

import jax
import jax.numpy as jnp
from jax import lax
from jax.experimental import pallas as pl
from jax.experimental.pallas import tpu as pltpu


# -----------------------------------------------------------------------------
# Fused kernel: RK4 integration + batched aleatoric covariance head.
# -----------------------------------------------------------------------------
def _fused_forward_kernel(dt_ref,                       # SMEM [T] scalars
                          z0_ref,                       # VMEM [B, D]
                          w1_ref, b1_ref, w2_ref, b2_ref,     # dynamics params
                          wc1_ref, bc1_ref, wc2_ref, bc2_ref, # covariance params
                          zt_ref, var_ref):             # VMEM [T, B, D] outputs
    T, B, D = zt_ref.shape
    H = w1_ref.shape[1]

    # Hoist weight loads and bias broadcasts out of the unrolled loop
    # (broadcast_in_dim is not CSE'd; it would be re-emitted ~4x per step).
    w1 = w1_ref[...]
    w2 = w2_ref[...]
    b1v = jnp.broadcast_to(b1_ref[...], (B, H))
    b2v = jnp.broadcast_to(b2_ref[...], (B, D))

    def f(z):
        h = jnp.tanh(jnp.dot(z, w1, preferred_element_type=jnp.float32) + b1v)
        return jnp.dot(h, w2, preferred_element_type=jnp.float32) + b2v

    # Initial state is emitted as-is (matches odeint semantics).
    z0 = z0_ref[...]
    zt_ref[0] = z0

    def step(i, z):
        dt = dt_ref[i]
        half = 0.5 * dt
        sixth = dt * (1.0 / 6.0)
        two_sixth = 2.0 * sixth

        # Incremental combine: k1..k4 never all live at once.
        k1 = f(z)
        acc = z + sixth * k1
        k2 = f(z + half * k1)
        acc = acc + two_sixth * k2
        k3 = f(z + half * k2)
        acc = acc + two_sixth * k3
        k4 = f(z + dt * k3)
        z_new = acc + sixth * k4

        zt_ref[i] = z_new
        return z_new

    # Short, fixed trip count -> fully unrolled for scheduler visibility.
    lax.fori_loop(1, T, step, z0, unroll=True)

    # --- Covariance head, OFF the serial chain, batched over T*B rows. -------
    # (T,B,D) -> (T*B,D) merges leading dims only (last dim untouched), so the
    # VMEM layout is preserved; the head is two matmuls with M = T*B sublanes.
    zt_all = zt_ref[...].reshape(T * B, D)
    hc = jnp.tanh(
        jnp.dot(zt_all, wc1_ref[...], preferred_element_type=jnp.float32)
        + bc1_ref[...])
    s = (jnp.dot(hc, wc2_ref[...], preferred_element_type=jnp.float32)
         + bc2_ref[...])
    var_ref[...] = (jax.nn.softplus(s) + 1e-6).reshape(T, B, D)


def _fused_forward(z0, t, params):
    B, D = z0.shape
    T = t.shape[0]
    # dt[0] = 0 (unused; initial state emitted directly), dt[i] = t[i] - t[i-1]
    dt = jnp.concatenate(
        [jnp.zeros((1,), t.dtype), jnp.diff(t)]).astype(jnp.float32)

    vmem = pl.BlockSpec(memory_space=pltpu.MemorySpace.VMEM)
    smem = pl.BlockSpec(memory_space=pltpu.MemorySpace.SMEM)

    zt, var = pl.pallas_call(
        _fused_forward_kernel,
        out_shape=(jax.ShapeDtypeStruct((T, B, D), jnp.float32),
                   jax.ShapeDtypeStruct((T, B, D), jnp.float32)),
        in_specs=[smem,                      # dt [T]
                  vmem,                      # z0
                  vmem, vmem, vmem, vmem,    # W1, b1, W2, b2
                  vmem, vmem, vmem, vmem],   # Wc1, bc1, Wc2, bc2
        out_specs=(vmem, vmem),
    )(dt, z0,
      params["w1"], params["b1"], params["w2"], params["b2"],
      params["wc1"], params["bc1"], params["wc2"], params["bc2"])
    return zt, var


# -----------------------------------------------------------------------------
# AleotoricWrapper.forward equivalent.
# -----------------------------------------------------------------------------
@functools.partial(jax.jit, static_argnames=("n_samples",))
def aleotoric_wrapper_forward(z, t, params, n_samples=10):
    # n_samples is never used by the reference forward (no MC sampling in the
    # returned computation); model.eval()/no_grad() have no Pallas analogue.
    del n_samples
    zt_pred, var = _fused_forward(z, t, params)
    # var already has zt_pred.shape -> the .reshape(*zt_pred.shape) is a no-op.
    return zt_pred, var


# -----------------------------------------------------------------------------
# Pure-JAX reference (for correctness check only).
# -----------------------------------------------------------------------------
def _ref_forward(z, t, p):
    def f(zz):
        return jnp.tanh(zz @ p["w1"] + p["b1"]) @ p["w2"] + p["b2"]

    states = [z]
    zc = z
    for i in range(1, t.shape[0]):
        dt = t[i] - t[i - 1]
        k1 = f(zc)
        k2 = f(zc + 0.5 * dt * k1)
        k3 = f(zc + 0.5 * dt * k2)
        k4 = f(zc + dt * k3)
        zc = zc + (dt / 6.0) * (k1 + 2 * k2 + 2 * k3 + k4)
        states.append(zc)
    zt = jnp.stack(states, axis=0)
    s = jnp.tanh(zt @ p["wc1"] + p["bc1"]) @ p["wc2"] + p["bc2"]
    return zt, jax.nn.softplus(s) + 1e-6


if __name__ == "__main__":
    B, D, H, T = 8, 32, 32, 8

    key = jax.random.PRNGKey(0)
    keys = jax.random.split(key, 10)

    params = {
        "w1":  0.2 * jax.random.normal(keys[0], (D, H), jnp.float32),
        "b1":  0.1 * jax.random.normal(keys[1], (1, H), jnp.float32),
        "w2":  0.2 * jax.random.normal(keys[2], (H, D), jnp.float32),
        "b2":  0.1 * jax.random.normal(keys[3], (1, D), jnp.float32),
        "wc1": 0.2 * jax.random.normal(keys[4], (D, H), jnp.float32),
        "bc1": 0.1 * jax.random.normal(keys[5], (1, H), jnp.float32),
        "wc2": 0.2 * jax.random.normal(keys[6], (H, D), jnp.float32),
        "bc2": 0.1 * jax.random.normal(keys[7], (1, D), jnp.float32),
    }

    z = jax.random.normal(keys[8], (B, D), jnp.float32)
    t = jnp.linspace(0.0, 1.0, T, dtype=jnp.float32)

    zt_pred, var = aleotoric_wrapper_forward(z, t, params, n_samples=10)
    jax.block_until_ready((zt_pred, var))

    zt_ref, var_ref = _ref_forward(z, t, params)
    assert zt_pred.shape == (T, B, D) and var.shape == (T, B, D)
    assert jnp.allclose(zt_pred, zt_ref, atol=1e-4, rtol=1e-4)
    assert jnp.allclose(var, var_ref, atol=1e-4, rtol=1e-4)

    print("KERNEL_OK")
</pallas_src>

<mosaic_0001>
module attributes {stable_mosaic.version = 11 : i64} {
  func.func @_fused_forward_kernel(%arg0: memref<8xf32, #tpu.memory_space<smem>>, %arg1: memref<8x32xf32, #tpu.memory_space<vmem>>, %arg2: memref<32x32xf32, #tpu.memory_space<vmem>>, %arg3: memref<1x32xf32, #tpu.memory_space<vmem>>, %arg4: memref<32x32xf32, #tpu.memory_space<vmem>>, %arg5: memref<1x32xf32, #tpu.memory_space<vmem>>, %arg6: memref<32x32xf32, #tpu.memory_space<vmem>>, %arg7: memref<1x32xf32, #tpu.memory_space<vmem>>, %arg8: memref<32x32xf32, #tpu.memory_space<vmem>>, %arg9: memref<1x32xf32, #tpu.memory_space<vmem>>, %arg10: memref<8x8x32xf32, #tpu.memory_space<vmem>>, %arg11: memref<8x8x32xf32, #tpu.memory_space<vmem>>) attributes {dimension_semantics = [], scalar_prefetch = 0 : i64, scratch_operands = 0 : i64, tpu.core_type = #tpu.core_type<tc>} {
    %c0 = arith.constant 0 : index
    %c0_0 = arith.constant 0 : index
    %0 = vector.load %arg2[%c0, %c0_0] : memref<32x32xf32, #tpu.memory_space<vmem>>, vector<32x32xf32>
    %c0_1 = arith.constant 0 : index
    %c0_2 = arith.constant 0 : index
    %1 = vector.load %arg4[%c0_1, %c0_2] : memref<32x32xf32, #tpu.memory_space<vmem>>, vector<32x32xf32>
    %c0_3 = arith.constant 0 : index
    %c0_4 = arith.constant 0 : index
    %2 = vector.load %arg3[%c0_3, %c0_4] : memref<1x32xf32, #tpu.memory_space<vmem>>, vector<1x32xf32>
    %3 = vector.shape_cast %2 : vector<1x32xf32> to vector<1x32xf32>
    %4 = vector.broadcast %3 : vector<1x32xf32> to vector<8x32xf32>
    %c0_5 = arith.constant 0 : index
    %c0_6 = arith.constant 0 : index
    %5 = vector.load %arg5[%c0_5, %c0_6] : memref<1x32xf32, #tpu.memory_space<vmem>>, vector<1x32xf32>
    %6 = vector.shape_cast %5 : vector<1x32xf32> to vector<1x32xf32>
    %7 = vector.broadcast %6 : vector<1x32xf32> to vector<8x32xf32>
    %c0_7 = arith.constant 0 : index
    %c0_8 = arith.constant 0 : index
    %8 = vector.load %arg1[%c0_7, %c0_8] : memref<8x32xf32, #tpu.memory_space<vmem>>, vector<8x32xf32>
    %c0_9 = arith.constant 0 : index
    %c0_10 = arith.constant 0 : index
    %c0_11 = arith.constant 0 : index
    %9 = vector.load %arg10[%c0_9, %c0_10, %c0_11] : memref<8x8x32xf32, #tpu.memory_space<vmem>>, vector<1x8x32xf32>
    %10 = vector.shape_cast %9 : vector<1x8x32xf32> to vector<8x32xf32>
    %11 = vector.shape_cast %8 : vector<8x32xf32> to vector<1x8x32xf32>
    tpu.vector_store %arg10[%c0_9, %c0_10, %c0_11], %11 {strides = array<i32>} : memref<8x8x32xf32, #tpu.memory_space<vmem>>, vector<1x8x32xf32>,
    %c1_i32 = arith.constant 1 : i32
    %12 = arith.index_cast %c1_i32 : i32 to index
    %13 = memref.load %arg0[%12] : memref<8xf32, #tpu.memory_space<smem>>
    %cst = arith.constant 5.000000e-01 : f32
    %14 = arith.mulf %cst, %13 : f32
    %cst_12 = arith.constant 0.166666672 : f32
    %15 = arith.mulf %13, %cst_12 : f32
    %cst_13 = arith.constant 2.000000e+00 : f32
    %16 = arith.mulf %cst_13, %15 : f32
    %cst_14 = arith.constant dense<0.000000e+00> : vector<8x32xf32>
    %17 = tpu.matmul %8, %0, %cst_14 {dimension_numbers = #tpu.dot_dimension_numbers<[1], [0], [0], [1], [0, 0, 1, 1], [], []>} : vector<8x32xf32>, vector<32x32xf32>, vector<8x32xf32> -> vector<8x32xf32>
    %18 = arith.addf %17, %4 : vector<8x32xf32>
    %19 = math.tanh %18 : vector<8x32xf32>
    %cst_15 = arith.constant dense<0.000000e+00> : vector<8x32xf32>
    %20 = tpu.matmul %19, %1, %cst_15 {dimension_numbers = #tpu.dot_dimension_numbers<[1], [0], [0], [1], [0, 0, 1, 1], [], []>} : vector<8x32xf32>, vector<32x32xf32>, vector<8x32xf32> -> vector<8x32xf32>
    %21 = arith.addf %20, %7 : vector<8x32xf32>
    %22 = vector.broadcast %15 : f32 to vector<8x32xf32>
    %23 = arith.mulf %22, %21 : vector<8x32xf32>
    %24 = arith.addf %8, %23 : vector<8x32xf32>
    %25 = vector.broadcast %14 : f32 to vector<8x32xf32>
    %26 = arith.mulf %25, %21 : vector<8x32xf32>
    %27 = arith.addf %8, %26 : vector<8x32xf32>
    %cst_16 = arith.constant dense<0.000000e+00> : vector<8x32xf32>
    %28 = tpu.matmul %27, %0, %cst_16 {dimension_numbers = #tpu.dot_dimension_numbers<[1], [0], [0], [1], [0, 0, 1, 1], [], []>} : vector<8x32xf32>, vector<32x32xf32>, vector<8x32xf32> -> vector<8x32xf32>
    %29 = arith.addf %28, %4 : vector<8x32xf32>
    %30 = math.tanh %29 : vector<8x32xf32>
    %cst_17 = arith.constant dense<0.000000e+00> : vector<8x32xf32>
    %31 = tpu.matmul %30, %1, %cst_17 {dimension_numbers = #tpu.dot_dimension_numbers<[1], [0], [0], [1], [0, 0, 1, 1], [], []>} : vector<8x32xf32>, vector<32x32xf32>, vector<8x32xf32> -> vector<8x32xf32>
    %32 = arith.addf %31, %7 : vector<8x32xf32>
    %33 = vector.broadcast %16 : f32 to vector<8x32xf32>
    %34 = arith.mulf %33, %32 : vector<8x32xf32>
    %35 = arith.addf %24, %34 : vector<8x32xf32>
    %36 = vector.broadcast %14 : f32 to vector<8x32xf32>
    %37 = arith.mulf %36, %32 : vector<8x32xf32>
    %38 = arith.addf %8, %37 : vector<8x32xf32>
    %cst_18 = arith.constant dense<0.000000e+00> : vector<8x32xf32>
    %39 = tpu.matmul %38, %0, %cst_18 {dimension_numbers = #tpu.dot_dimension_numbers<[1], [0], [0], [1], [0, 0, 1, 1], [], []>} : vector<8x32xf32>, vector<32x32xf32>, vector<8x32xf32> -> vector<8x32xf32>
    %40 = arith.addf %39, %4 : vector<8x32xf32>
    %41 = math.tanh %40 : vector<8x32xf32>
    %cst_19 = arith.constant dense<0.000000e+00> : vector<8x32xf32>
    %42 = tpu.matmul %41, %1, %cst_19 {dimension_numbers = #tpu.dot_dimension_numbers<[1], [0], [0], [1], [0, 0, 1, 1], [], []>} : vector<8x32xf32>, vector<32x32xf32>, vector<8x32xf32> -> vector<8x32xf32>
    %43 = arith.addf %42, %7 : vector<8x32xf32>
    %44 = vector.broadcast %16 : f32 to vector<8x32xf32>
    %45 = arith.mulf %44, %43 : vector<8x32xf32>
    %46 = arith.addf %35, %45 : vector<8x32xf32>
    %47 = vector.broadcast %13 : f32 to vector<8x32xf32>
    %48 = arith.mulf %47, %43 : vector<8x32xf32>
    %49 = arith.addf %8, %48 : vector<8x32xf32>
    %cst_20 = arith.constant dense<0.000000e+00> : vector<8x32xf32>
    %50 = tpu.matmul %49, %0, %cst_20 {dimension_numbers = #tpu.dot_dimension_numbers<[1], [0], [0], [1], [0, 0, 1, 1], [], []>} : vector<8x32xf32>, vector<32x32xf32>, vector<8x32xf32> -> vector<8x32xf32>
    %51 = arith.addf %50, %4 : vector<8x32xf32>
    %52 = math.tanh %51 : vector<8x32xf32>
    %cst_21 = arith.constant dense<0.000000e+00> : vector<8x32xf32>
    %53 = tpu.matmul %52, %1, %cst_21 {dimension_numbers = #tpu.dot_dimension_numbers<[1], [0], [0], [1], [0, 0, 1, 1], [], []>} : vector<8x32xf32>, vector<32x32xf32>, vector<8x32xf32> -> vector<8x32xf32>
    %54 = arith.addf %53, %7 : vector<8x32xf32>
    %55 = vector.broadcast %15 : f32 to vector<8x32xf32>
    %56 = arith.mulf %55, %54 : vector<8x32xf32>
    %57 = arith.addf %46, %56 : vector<8x32xf32>
    %58 = arith.index_cast %c1_i32 : i32 to index
    %c0_22 = arith.constant 0 : index
    %c0_23 = arith.constant 0 : index
    %59 = vector.load %arg10[%58, %c0_22, %c0_23] : memref<8x8x32xf32, #tpu.memory_space<vmem>>, vector<1x8x32xf32>
    %60 = vector.shape_cast %59 : vector<1x8x32xf32> to vector<8x32xf32>
    %61 = vector.shape_cast %57 : vector<8x32xf32> to vector<1x8x32xf32>
    tpu.vector_store %arg10[%58, %c0_22, %c0_23], %61 {strides = array<i32>} : memref<8x8x32xf32, #tpu.memory_space<vmem>>, vector<1x8x32xf32>,
    %c2_i32 = arith.constant 2 : i32
    %62 = arith.index_cast %c2_i32 : i32 to index
    %63 = memref.load %arg0[%62] : memref<8xf32, #tpu.memory_space<smem>>
    %cst_24 = arith.constant 5.000000e-01 : f32
    %64 = arith.mulf %cst_24, %63 : f32
    %cst_25 = arith.constant 0.166666672 : f32
    %65 = arith.mulf %63, %cst_25 : f32
    %cst_26 = arith.constant 2.000000e+00 : f32
    %66 = arith.mulf %cst_26, %65 : f32
    %cst_27 = arith.constant dense<0.000000e+00> : vector<8x32xf32>
    %67 = tpu.matmul %57, %0, %cst_27 {dimension_numbers = #tpu.dot_dimension_numbers<[1], [0], [0], [1], [0, 0, 1, 1], [], []>} : vector<8x32xf32>, vector<32x32xf32>, vector<8x32xf32> -> vector<8x32xf32>
    %68 = arith.addf %67, %4 : vector<8x32xf32>
    %69 = math.tanh %68 : vector<8x32xf32>
    %cst_28 = arith.constant dense<0.000000e+00> : vector<8x32xf32>
    %70 = tpu.matmul %69, %1, %cst_28 {dimension_numbers = #tpu.dot_dimension_numbers<[1], [0], [0], [1], [0, 0, 1, 1], [], []>} : vector<8x32xf32>, vector<32x32xf32>, vector<8x32xf32> -> vector<8x32xf32>
    %71 = arith.addf %70, %7 : vector<8x32xf32>
    %72 = vector.broadcast %65 : f32 to vector<8x32xf32>
    %73 = arith.mulf %72, %71 : vector<8x32xf32>
    %74 = arith.addf %57, %73 : vector<8x32xf32>
    %75 = vector.broadcast %64 : f32 to vector<8x32xf32>
    %76 = arith.mulf %75, %71 : vector<8x32xf32>
    %77 = arith.addf %57, %76 : vector<8x32xf32>
    %cst_29 = arith.constant dense<0.000000e+00> : vector<8x32xf32>
    %78 = tpu.matmul %77, %0, %cst_29 {dimension_numbers = #tpu.dot_dimension_numbers<[1], [0], [0], [1], [0, 0, 1, 1], [], []>} : vector<8x32xf32>, vector<32x32xf32>, vector<8x32xf32> -> vector<8x32xf32>
    %79 = arith.addf %78, %4 : vector<8x32xf32>
    %80 = math.tanh %79 : vector<8x32xf32>
    %cst_30 = arith.constant dense<0.000000e+00> : vector<8x32xf32>
    %81 = tpu.matmul %80, %1, %cst_30 {dimension_numbers = #tpu.dot_dimension_numbers<[1], [0], [0], [1], [0, 0, 1, 1], [], []>} : vector<8x32xf32>, vector<32x32xf32>, vector<8x32xf32> -> vector<8x32xf32>
    %82 = arith.addf %81, %7 : vector<8x32xf32>
    %83 = vector.broadcast %66 : f32 to vector<8x32xf32>
    %84 = arith.mulf %83, %82 : vector<8x32xf32>
    %85 = arith.addf %74, %84 : vector<8x32xf32>
    %86 = vector.broadcast %64 : f32 to vector<8x32xf32>
    %87 = arith.mulf %86, %82 : vector<8x32xf32>
    %88 = arith.addf %57, %87 : vector<8x32xf32>
    %cst_31 = arith.constant dense<0.000000e+00> : vector<8x32xf32>
    %89 = tpu.matmul %88, %0, %cst_31 {dimension_numbers = #tpu.dot_dimension_numbers<[1], [0], [0], [1], [0, 0, 1, 1], [], []>} : vector<8x32xf32>, vector<32x32xf32>, vector<8x32xf32> -> vector<8x32xf32>
    %90 = arith.addf %89, %4 : vector<8x32xf32>
    %91 = math.tanh %90 : vector<8x32xf32>
    %cst_32 = arith.constant dense<0.000000e+00> : vector<8x32xf32>
    %92 = tpu.matmul %91, %1, %cst_32 {dimension_numbers = #tpu.dot_dimension_numbers<[1], [0], [0], [1], [0, 0, 1, 1], [], []>} : vector<8x32xf32>, vector<32x32xf32>, vector<8x32xf32> -> vector<8x32xf32>
    %93 = arith.addf %92, %7 : vector<8x32xf32>
    %94 = vector.broadcast %66 : f32 to vector<8x32xf32>
    %95 = arith.mulf %94, %93 : vector<8x32xf32>
    %96 = arith.addf %85, %95 : vector<8x32xf32>
    %97 = vector.broadcast %63 : f32 to vector<8x32xf32>
    %98 = arith.mulf %97, %93 : vector<8x32xf32>
    %99 = arith.addf %57, %98 : vector<8x32xf32>
    %cst_33 = arith.constant dense<0.000000e+00> : vector<8x32xf32>
    %100 = tpu.matmul %99, %0, %cst_33 {dimension_numbers = #tpu.dot_dimension_numbers<[1], [0], [0], [1], [0, 0, 1, 1], [], []>} : vector<8x32xf32>, vector<32x32xf32>, vector<8x32xf32> -> vector<8x32xf32>
    %101 = arith.addf %100, %4 : vector<8x32xf32>
    %102 = math.tanh %101 : vector<8x32xf32>
    %cst_34 = arith.constant dense<0.000000e+00> : vector<8x32xf32>
    %103 = tpu.matmul %102, %1, %cst_34 {dimension_numbers = #tpu.dot_dimension_numbers<[1], [0], [0], [1], [0, 0, 1, 1], [], []>} : vector<8x32xf32>, vector<32x32xf32>, vector<8x32xf32> -> vector<8x32xf32>
    %104 = arith.addf %103, %7 : vector<8x32xf32>
    %105 = vector.broadcast %65 : f32 to vector<8x32xf32>
    %106 = arith.mulf %105, %104 : vector<8x32xf32>
    %107 = arith.addf %96, %106 : vector<8x32xf32>
    %108 = arith.index_cast %c2_i32 : i32 to index
    %c0_35 = arith.constant 0 : index
    %c0_36 = arith.constant 0 : index
    %109 = vector.load %arg10[%108, %c0_35, %c0_36] : memref<8x8x32xf32, #tpu.memory_space<vmem>>, vector<1x8x32xf32>
    %110 = vector.shape_cast %109 : vector<1x8x32xf32> to vector<8x32xf32>
    %111 = vector.shape_cast %107 : vector<8x32xf32> to vector<1x8x32xf32>
    tpu.vector_store %arg10[%108, %c0_35, %c0_36], %111 {strides = array<i32>} : memref<8x8x32xf32, #tpu.memory_space<vmem>>, vector<1x8x32xf32>,
    %c3_i32 = arith.constant 3 : i32
    %112 = arith.index_cast %c3_i32 : i32 to index
    %113 = memref.load %arg0[%112] : memref<8xf32, #tpu.memory_space<smem>>
    %cst_37 = arith.constant 5.000000e-01 : f32
    %114 = arith.mulf %cst_37, %113 : f32
    %cst_38 = arith.constant 0.166666672 : f32
    %115 = arith.mulf %113, %cst_38 : f32
    %cst_39 = arith.constant 2.000000e+00 : f32
    %116 = arith.mulf %cst_39, %115 : f32
    %cst_40 = arith.constant dense<0.000000e+00> : vector<8x32xf32>
    %117 = tpu.matmul %107, %0, %cst_40 {dimension_numbers = #tpu.dot_dimension_numbers<[1], [0], [0], [1], [0, 0, 1, 1], [], []>} : vector<8x32xf32>, vector<32x32xf32>, vector<8x32xf32> -> vector<8x32xf32>
    %118 = arith.addf %117, %4 : vector<8x32xf32>
    %119 = math.tanh %118 : vector<8x32xf32>
    %cst_41 = arith.constant dense<0.000000e+00> : vector<8x32xf32>
    %120 = tpu.matmul %119, %1, %cst_41 {dimension_numbers = #tpu.dot_dimension_numbers<[1], [0], [0], [1], [0, 0, 1, 1], [], []>} : vector<8x32xf32>, vector<32x32xf32>, vector<8x32xf32> -> vector<8x32xf32>
    %121 = arith.addf %120, %7 : vector<8x32xf32>
    %122 = vector.broadcast %115 : f32 to vector<8x32xf32>
    %123 = arith.mulf %122, %121 : vector<8x32xf32>
    %124 = arith.addf %107, %123 : vector<8x32xf32>
    %125 = vector.broadcast %114 : f32 to vector<8x32xf32>
    %126 = arith.mulf %125, %121 : vector<8x32xf32>
    %127 = arith.addf %107, %126 : vector<8x32xf32>
    %cst_42 = arith.constant dense<0.000000e+00> : vector<8x32xf32>
    %128 = tpu.matmul %127, %0, %cst_42 {dimension_numbers = #tpu.dot_dimension_numbers<[1], [0], [0], [1], [0, 0, 1, 1], [], []>} : vector<8x32xf32>, vector<32x32xf32>, vector<8x32xf32> -> vector<8x32xf32>
    %129 = arith.addf %128, %4 : vector<8x32xf32>
    %130 = math.tanh %129 : vector<8x32xf32>
    %cst_43 = arith.constant dense<0.000000e+00> : vector<8x32xf32>
    %131 = tpu.matmul %130, %1, %cst_43 {dimension_numbers = #tpu.dot_dimension_numbers<[1], [0], [0], [1], [0, 0, 1, 1], [], []>} : vector<8x32xf32>, vector<32x32xf32>, vector<8x32xf32> -> vector<8x32xf32>
    %132 = arith.addf %131, %7 : vector<8x32xf32>
    %133 = vector.broadcast %116 : f32 to vector<8x32xf32>
    %134 = arith.mulf %133, %132 : vector<8x32xf32>
    %135 = arith.addf %124, %134 : vector<8x32xf32>
    %136 = vector.broadcast %114 : f32 to vector<8x32xf32>
    %137 = arith.mulf %136, %132 : vector<8x32xf32>
    %138 = arith.addf %107, %137 : vector<8x32xf32>
    %cst_44 = arith.constant dense<0.000000e+00> : vector<8x32xf32>
    %139 = tpu.matmul %138, %0, %cst_44 {dimension_numbers = #tpu.dot_dimension_numbers<[1], [0], [0], [1], [0, 0, 1, 1], [], []>} : vector<8x32xf32>, vector<32x32xf32>, vector<8x32xf32> -> vector<8x32xf32>
    %140 = arith.addf %139, %4 : vector<8x32xf32>
    %141 = math.tanh %140 : vector<8x32xf32>
    %cst_45 = arith.constant dense<0.000000e+00> : vector<8x32xf32>
    %142 = tpu.matmul %141, %1, %cst_45 {dimension_numbers = #tpu.dot_dimension_numbers<[1], [0], [0], [1], [0, 0, 1, 1], [], []>} : vector<8x32xf32>, vector<32x32xf32>, vector<8x32xf32> -> vector<8x32xf32>
    %143 = arith.addf %142, %7 : vector<8x32xf32>
    %144 = vector.broadcast %116 : f32 to vector<8x32xf32>
    %145 = arith.mulf %144, %143 : vector<8x32xf32>
    %146 = arith.addf %135, %145 : vector<8x32xf32>
    %147 = vector.broadcast %113 : f32 to vector<8x32xf32>
    %148 = arith.mulf %147, %143 : vector<8x32xf32>
    %149 = arith.addf %107, %148 : vector<8x32xf32>
    %cst_46 = arith.constant dense<0.000000e+00> : vector<8x32xf32>
    %150 = tpu.matmul %149, %0, %cst_46 {dimension_numbers = #tpu.dot_dimension_numbers<[1], [0], [0], [1], [0, 0, 1, 1], [], []>} : vector<8x32xf32>, vector<32x32xf32>, vector<8x32xf32> -> vector<8x32xf32>
    %151 = arith.addf %150, %4 : vector<8x32xf32>
    %152 = math.tanh %151 : vector<8x32xf32>
    %cst_47 = arith.constant dense<0.000000e+00> : vector<8x32xf32>
    %153 = tpu.matmul %152, %1, %cst_47 {dimension_numbers = #tpu.dot_dimension_numbers<[1], [0], [0], [1], [0, 0, 1, 1], [], []>} : vector<8x32xf32>, vector<32x32xf32>, vector<8x32xf32> -> vector<8x32xf32>
    %154 = arith.addf %153, %7 : vector<8x32xf32>
    %155 = vector.broadcast %115 : f32 to vector<8x32xf32>
    %156 = arith.mulf %155, %154 : vector<8x32xf32>
    %157 = arith.addf %146, %156 : vector<8x32xf32>
    %158 = arith.index_cast %c3_i32 : i32 to index
    %c0_48 = arith.constant 0 : index
    %c0_49 = arith.constant 0 : index
    %159 = vector.load %arg10[%158, %c0_48, %c0_49] : memref<8x8x32xf32, #tpu.memory_space<vmem>>, vector<1x8x32xf32>
    %160 = vector.shape_cast %159 : vector<1x8x32xf32> to vector<8x32xf32>
    %161 = vector.shape_cast %157 : vector<8x32xf32> to vector<1x8x32xf32>
    tpu.vector_store %arg10[%158, %c0_48, %c0_49], %161 {strides = array<i32>} : memref<8x8x32xf32, #tpu.memory_space<vmem>>, vector<1x8x32xf32>,
    %c4_i32 = arith.constant 4 : i32
    %162 = arith.index_cast %c4_i32 : i32 to index
    %163 = memref.load %arg0[%162] : memref<8xf32, #tpu.memory_space<smem>>
    %cst_50 = arith.constant 5.000000e-01 : f32
    %164 = arith.mulf %cst_50, %163 : f32
    %cst_51 = arith.constant 0.166666672 : f32
    %165 = arith.mulf %163, %cst_51 : f32
    %cst_52 = arith.constant 2.000000e+00 : f32
    %166 = arith.mulf %cst_52, %165 : f32
    %cst_53 = arith.constant dense<0.000000e+00> : vector<8x32xf32>
    %167 = tpu.matmul %157, %0, %cst_53 {dimension_numbers = #tpu.dot_dimension_numbers<[1], [0], [0], [1], [0, 0, 1, 1], [], []>} : vector<8x32xf32>, vector<32x32xf32>, vector<8x32xf32> -> vector<8x32xf32>
    %168 = arith.addf %167, %4 : vector<8x32xf32>
    %169 = math.tanh %168 : vector<8x32xf32>
    %cst_54 = arith.constant dense<0.000000e+00> : vector<8x32xf32>
    %170 = tpu.matmul %169, %1, %cst_54 {dimension_numbers = #tpu.dot_dimension_numbers<[1], [0], [0], [1], [0, 0, 1, 1], [], []>} : vector<8x32xf32>, vector<32x32xf32>, vector<8x32xf32> -> vector<8x32xf32>
    %171 = arith.addf %170, %7 : vector<8x32xf32>
    %172 = vector.broadcast %165 : f32 to vector<8x32xf32>
    %173 = arith.mulf %172, %171 : vector<8x32xf32>
    %174 = arith.addf %157, %173 : vector<8x32xf32>
    %175 = vector.broadcast %164 : f32 to vector<8x32xf32>
    %176 = arith.mulf %175, %171 : vector<8x32xf32>
    %177 = arith.addf %157, %176 : vector<8x32xf32>
    %cst_55 = arith.constant dense<0.000000e+00> : vector<8x32xf32>
    %178 = tpu.matmul %177, %0, %cst_55 {dimension_numbers = #tpu.dot_dimension_numbers<[1], [0], [0], [1], [0, 0, 1, 1], [], []>} : vector<8x32xf32>, vector<32x32xf32>, vector<8x32xf32> -> vector<8x32xf32>
    %179 = arith.addf %178, %4 : vector<8x32xf32>
    %180 = math.tanh %179 : vector<8x32xf32>
    %cst_56 = arith.constant dense<0.000000e+00> : vector<8x32xf32>
    %181 = tpu.matmul %180, %1, %cst_56 {dimension_numbers = #tpu.dot_dimension_numbers<[1], [0], [0], [1], [0, 0, 1, 1], [], []>} : vector<8x32xf32>, vector<32x32xf32>, vector<8x32xf32> -> vector<8x32xf32>
    %182 = arith.addf %181, %7 : vector<8x32xf32>
    %183 = vector.broadcast %166 : f32 to vector<8x32xf32>
    %184 = arith.mulf %183, %182 : vector<8x32xf32>
    %185 = arith.addf %174, %184 : vector<8x32xf32>
    %186 = vector.broadcast %164 : f32 to vector<8x32xf32>
    %187 = arith.mulf %186, %182 : vector<8x32xf32>
    %188 = arith.addf %157, %187 : vector<8x32xf32>
    %cst_57 = arith.constant dense<0.000000e+00> : vector<8x32xf32>
    %189 = tpu.matmul %188, %0, %cst_57 {dimension_numbers = #tpu.dot_dimension_numbers<[1], [0], [0], [1], [0, 0, 1, 1], [], []>} : vector<8x32xf32>, vector<32x32xf32>, vector<8x32xf32> -> vector<8x32xf32>
    %190 = arith.addf %189, %4 : vector<8x32xf32>
    %191 = math.tanh %190 : vector<8x32xf32>
    %cst_58 = arith.constant dense<0.000000e+00> : vector<8x32xf32>
    %192 = tpu.matmul %191, %1, %cst_58 {dimension_numbers = #tpu.dot_dimension_numbers<[1], [0], [0], [1], [0, 0, 1, 1], [], []>} : vector<8x32xf32>, vector<32x32xf32>, vector<8x32xf32> -> vector<8x32xf32>
    %193 = arith.addf %192, %7 : vector<8x32xf32>
    %194 = vector.broadcast %166 : f32 to vector<8x32xf32>
    %195 = arith.mulf %194, %193 : vector<8x32xf32>
    %196 = arith.addf %185, %195 : vector<8x32xf32>
    %197 = vector.broadcast %163 : f32 to vector<8x32xf32>
    %198 = arith.mulf %197, %193 : vector<8x32xf32>
    %199 = arith.addf %157, %198 : vector<8x32xf32>
    %cst_59 = arith.constant dense<0.000000e+00> : vector<8x32xf32>
    %200 = tpu.matmul %199, %0, %cst_59 {dimension_numbers = #tpu.dot_dimension_numbers<[1], [0], [0], [1], [0, 0, 1, 1], [], []>} : vector<8x32xf32>, vector<32x32xf32>, vector<8x32xf32> -> vector<8x32xf32>
    %201 = arith.addf %200, %4 : vector<8x32xf32>
    %202 = math.tanh %201 : vector<8x32xf32>
    %cst_60 = arith.constant dense<0.000000e+00> : vector<8x32xf32>
    %203 = tpu.matmul %202, %1, %cst_60 {dimension_numbers = #tpu.dot_dimension_numbers<[1], [0], [0], [1], [0, 0, 1, 1], [], []>} : vector<8x32xf32>, vector<32x32xf32>, vector<8x32xf32> -> vector<8x32xf32>
    %204 = arith.addf %203, %7 : vector<8x32xf32>
    %205 = vector.broadcast %165 : f32 to vector<8x32xf32>
    %206 = arith.mulf %205, %204 : vector<8x32xf32>
    %207 = arith.addf %196, %206 : vector<8x32xf32>
    %208 = arith.index_cast %c4_i32 : i32 to index
    %c0_61 = arith.constant 0 : index
    %c0_62 = arith.constant 0 : index
    %209 = vector.load %arg10[%208, %c0_61, %c0_62] : memref<8x8x32xf32, #tpu.memory_space<vmem>>, vector<1x8x32xf32>
    %210 = vector.shape_cast %209 : vector<1x8x32xf32> to vector<8x32xf32>
    %211 = vector.shape_cast %207 : vector<8x32xf32> to vector<1x8x32xf32>
    tpu.vector_store %arg10[%208, %c0_61, %c0_62], %211 {strides = array<i32>} : memref<8x8x32xf32, #tpu.memory_space<vmem>>, vector<1x8x32xf32>,
    %c5_i32 = arith.constant 5 : i32
    %212 = arith.index_cast %c5_i32 : i32 to index
    %213 = memref.load %arg0[%212] : memref<8xf32, #tpu.memory_space<smem>>
    %cst_63 = arith.constant 5.000000e-01 : f32
    %214 = arith.mulf %cst_63, %213 : f32
    %cst_64 = arith.constant 0.166666672 : f32
    %215 = arith.mulf %213, %cst_64 : f32
    %cst_65 = arith.constant 2.000000e+00 : f32
    %216 = arith.mulf %cst_65, %215 : f32
    %cst_66 = arith.constant dense<0.000000e+00> : vector<8x32xf32>
    %217 = tpu.matmul %207, %0, %cst_66 {dimension_numbers = #tpu.dot_dimension_numbers<[1], [0], [0], [1], [0, 0, 1, 1], [], []>} : vector<8x32xf32>, vector<32x32xf32>, vector<8x32xf32> -> vector<8x32xf32>
    %218 = arith.addf %217, %4 : vector<8x32xf32>
    %219 = math.tanh %218 : vector<8x32xf32>
    %cst_67 = arith.constant dense<0.000000e+00> : vector<8x32xf32>
    %220 = tpu.matmul %219, %1, %cst_67 {dimension_numbers = #tpu.dot_dimension_numbers<[1], [0], [0], [1], [0, 0, 1, 1], [], []>} : vector<8x32xf32>, vector<32x32xf32>, vector<8x32xf32> -> vector<8x32xf32>
    %221 = arith.addf %220, %7 : vector<8x32xf32>
    %222 = vector.broadcast %215 : f32 to vector<8x32xf32>
    %223 = arith.mulf %222, %221 : vector<8x32xf32>
    %224 = arith.addf %207, %223 : vector<8x32xf32>
    %225 = vector.broadcast %214 : f32 to vector<8x32xf32>
    %226 = arith.mulf %225, %221 : vector<8x32xf32>
    %227 = arith.addf %207, %226 : vector<8x32xf32>
    %cst_68 = arith.constant dense<0.000000e+00> : vector<8x32xf32>
    %228 = tpu.matmul %227, %0, %cst_68 {dimension_numbers = #tpu.dot_dimension_numbers<[1], [0], [0], [1], [0, 0, 1, 1], [], []>} : vector<8x32xf32>, vector<32x32xf32>, vector<8x32xf32> -> vector<8x32xf32>
    %229 = arith.addf %228, %4 : vector<8x32xf32>
    %230 = math.tanh %229 : vector<8x32xf32>
    %cst_69 = arith.constant dense<0.000000e+00> : vector<8x32xf32>
    %231 = tpu.matmul %230, %1, %cst_69 {dimension_numbers = #tpu.dot_dimension_numbers<[1], [0], [0], [1], [0, 0, 1, 1], [], []>} : vector<8x32xf32>, vector<32x32xf32>, vector<8x32xf32> -> vector<8x32xf32>
    %232 = arith.addf %231, %7 : vector<8x32xf32>
    %233 = vector.broadcast %216 : f32 to vector<8x32xf32>
    %234 = arith.mulf %233, %232 : vector<8x32xf32>
    %235 = arith.addf %224, %234 : vector<8x32xf32>
    %236 = vector.broadcast %214 : f32 to vector<8x32xf32>
    %237 = arith.mulf %236, %232 : vector<8x32xf32>
    %238 = arith.addf %207, %237 : vector<8x32xf32>
    %cst_70 = arith.constant dense<0.000000e+00> : vector<8x32xf32>
    %239 = tpu.matmul %238, %0, %cst_70 {dimension_numbers = #tpu.dot_dimension_numbers<[1], [0], [0], [1], [0, 0, 1, 1], [], []>} : vector<8x32xf32>, vector<32x32xf32>, vector<8x32xf32> -> vector<8x32xf32>
    %240 = arith.addf %239, %4 : vector<8x32xf32>
    %241 = math.tanh %240 : vector<8x32xf32>
    %cst_71 = arith.constant dense<0.000000e+00> : vector<8x32xf32>
    %242 = tpu.matmul %241, %1, %cst_71 {dimension_numbers = #tpu.dot_dimension_numbers<[1], [0], [0], [1], [0, 0, 1, 1], [], []>} : vector<8x32xf32>, vector<32x32xf32>, vector<8x32xf32> -> vector<8x32xf32>
    %243 = arith.addf %242, %7 : vector<8x32xf32>
    %244 = vector.broadcast %216 : f32 to vector<8x32xf32>
    %245 = arith.mulf %244, %243 : vector<8x32xf32>
    %246 = arith.addf %235, %245 : vector<8x32xf32>
    %247 = vector.broadcast %213 : f32 to vector<8x32xf32>
    %248 = arith.mulf %247, %243 : vector<8x32xf32>
    %249 = arith.addf %207, %248 : vector<8x32xf32>
    %cst_72 = arith.constant dense<0.000000e+00> : vector<8x32xf32>
    %250 = tpu.matmul %249, %0, %cst_72 {dimension_numbers = #tpu.dot_dimension_numbers<[1], [0], [0], [1], [0, 0, 1, 1], [], []>} : vector<8x32xf32>, vector<32x32xf32>, vector<8x32xf32> -> vector<8x32xf32>
    %251 = arith.addf %250, %4 : vector<8x32xf32>
    %252 = math.tanh %251 : vector<8x32xf32>
    %cst_73 = arith.constant dense<0.000000e+00> : vector<8x32xf32>
    %253 = tpu.matmul %252, %1, %cst_73 {dimension_numbers = #tpu.dot_dimension_numbers<[1], [0], [0], [1], [0, 0, 1, 1], [], []>} : vector<8x32xf32>, vector<32x32xf32>, vector<8x32xf32> -> vector<8x32xf32>
    %254 = arith.addf %253, %7 : vector<8x32xf32>
    %255 = vector.broadcast %215 : f32 to vector<8x32xf32>
    %256 = arith.mulf %255, %254 : vector<8x32xf32>
    %257 = arith.addf %246, %256 : vector<8x32xf32>
    %258 = arith.index_cast %c5_i32 : i32 to index
    %c0_74 = arith.constant 0 : index
    %c0_75 = arith.constant 0 : index
    %259 = vector.load %arg10[%258, %c0_74, %c0_75] : memref<8x8x32xf32, #tpu.memory_space<vmem>>, vector<1x8x32xf32>
    %260 = vector.shape_cast %259 : vector<1x8x32xf32> to vector<8x32xf32>
    %261 = vector.shape_cast %257 : vector<8x32xf32> to vector<1x8x32xf32>
    tpu.vector_store %arg10[%258, %c0_74, %c0_75], %261 {strides = array<i32>} : memref<8x8x32xf32, #tpu.memory_space<vmem>>, vector<1x8x32xf32>,
    %c6_i32 = arith.constant 6 : i32
    %262 = arith.index_cast %c6_i32 : i32 to index
    %263 = memref.load %arg0[%262] : memref<8xf32, #tpu.memory_space<smem>>
    %cst_76 = arith.constant 5.000000e-01 : f32
    %264 = arith.mulf %cst_76, %263 : f32
    %cst_77 = arith.constant 0.166666672 : f32
    %265 = arith.mulf %263, %cst_77 : f32
    %cst_78 = arith.constant 2.000000e+00 : f32
    %266 = arith.mulf %cst_78, %265 : f32
    %cst_79 = arith.constant dense<0.000000e+00> : vector<8x32xf32>
    %267 = tpu.matmul %257, %0, %cst_79 {dimension_numbers = #tpu.dot_dimension_numbers<[1], [0], [0], [1], [0, 0, 1, 1], [], []>} : vector<8x32xf32>, vector<32x32xf32>, vector<8x32xf32> -> vector<8x32xf32>
    %268 = arith.addf %267, %4 : vector<8x32xf32>
    %269 = math.tanh %268 : vector<8x32xf32>
    %cst_80 = arith.constant dense<0.000000e+00> : vector<8x32xf32>
    %270 = tpu.matmul %269, %1, %cst_80 {dimension_numbers = #tpu.dot_dimension_numbers<[1], [0], [0], [1], [0, 0, 1, 1], [], []>} : vector<8x32xf32>, vector<32x32xf32>, vector<8x32xf32> -> vector<8x32xf32>
    %271 = arith.addf %270, %7 : vector<8x32xf32>
    %272 = vector.broadcast %265 : f32 to vector<8x32xf32>
    %273 = arith.mulf %272, %271 : vector<8x32xf32>
    %274 = arith.addf %257, %273 : vector<8x32xf32>
    %275 = vector.broadcast %264 : f32 to vector<8x32xf32>
    %276 = arith.mulf %275, %271 : vector<8x32xf32>
    %277 = arith.addf %257, %276 : vector<8x32xf32>
    %cst_81 = arith.constant dense<0.000000e+00> : vector<8x32xf32>
    %278 = tpu.matmul %277, %0, %cst_81 {dimension_numbers = #tpu.dot_dimension_numbers<[1], [0], [0], [1], [0, 0, 1, 1], [], []>} : vector<8x32xf32>, vector<32x32xf32>, vector<8x32xf32> -> vector<8x32xf32>
    %279 = arith.addf %278, %4 : vector<8x32xf32>
    %280 = math.tanh %279 : vector<8x32xf32>
    %cst_82 = arith.constant dense<0.000000e+00> : vector<8x32xf32>
    %281 = tpu.matmul %280, %1, %cst_82 {dimension_numbers = #tpu.dot_dimension_numbers<[1], [0], [0], [1], [0, 0, 1, 1], [], []>} : vector<8x32xf32>, vector<32x32xf32>, vector<8x32xf32> -> vector<8x32xf32>
    %282 = arith.addf %281, %7 : vector<8x32xf32>
    %283 = vector.broadcast %266 : f32 to vector<8x32xf32>
    %284 = arith.mulf %283, %282 : vector<8x32xf32>
    %285 = arith.addf %274, %284 : vector<8x32xf32>
    %286 = vector.broadcast %264 : f32 to vector<8x32xf32>
    %287 = arith.mulf %286, %282 : vector<8x32xf32>
    %288 = arith.addf %257, %287 : vector<8x32xf32>
    %cst_83 = arith.constant dense<0.000000e+00> : vector<8x32xf32>
    %289 = tpu.matmul %288, %0, %cst_83 {dimension_numbers = #tpu.dot_dimension_numbers<[1], [0], [0], [1], [0, 0, 1, 1], [], []>} : vector<8x32xf32>, vector<32x32xf32>, vector<8x32xf32> -> vector<8x32xf32>
    %290 = arith.addf %289, %4 : vector<8x32xf32>
    %291 = math.tanh %290 : vector<8x32xf32>
    %cst_84 = arith.constant dense<0.000000e+00> : vector<8x32xf32>
    %292 = tpu.matmul %291, %1, %cst_84 {dimension_numbers = #tpu.dot_dimension_numbers<[1], [0], [0], [1], [0, 0, 1, 1], [], []>} : vector<8x32xf32>, vector<32x32xf32>, vector<8x32xf32> -> vector<8x32xf32>
    %293 = arith.addf %292, %7 : vector<8x32xf32>
    %294 = vector.broadcast %266 : f32 to vector<8x32xf32>
    %295 = arith.mulf %294, %293 : vector<8x32xf32>
    %296 = arith.addf %285, %295 : vector<8x32xf32>
    %297 = vector.broadcast %263 : f32 to vector<8x32xf32>
    %298 = arith.mulf %297, %293 : vector<8x32xf32>
    %299 = arith.addf %257, %298 : vector<8x32xf32>
    %cst_85 = arith.constant dense<0.000000e+00> : vector<8x32xf32>
    %300 = tpu.matmul %299, %0, %cst_85 {dimension_numbers = #tpu.dot_dimension_numbers<[1], [0], [0], [1], [0, 0, 1, 1], [], []>} : vector<8x32xf32>, vector<32x32xf32>, vector<8x32xf32> -> vector<8x32xf32>
    %301 = arith.addf %300, %4 : vector<8x32xf32>
    %302 = math.tanh %301 : vector<8x32xf32>
    %cst_86 = arith.constant dense<0.000000e+00> : vector<8x32xf32>
    %303 = tpu.matmul %302, %1, %cst_86 {dimension_numbers = #tpu.dot_dimension_numbers<[1], [0], [0], [1], [0, 0, 1, 1], [], []>} : vector<8x32xf32>, vector<32x32xf32>, vector<8x32xf32> -> vector<8x32xf32>
    %304 = arith.addf %303, %7 : vector<8x32xf32>
    %305 = vector.broadcast %265 : f32 to vector<8x32xf32>
    %306 = arith.mulf %305, %304 : vector<8x32xf32>
    %307 = arith.addf %296, %306 : vector<8x32xf32>
    %308 = arith.index_cast %c6_i32 : i32 to index
    %c0_87 = arith.constant 0 : index
    %c0_88 = arith.constant 0 : index
    %309 = vector.load %arg10[%308, %c0_87, %c0_88] : memref<8x8x32xf32, #tpu.memory_space<vmem>>, vector<1x8x32xf32>
    %310 = vector.shape_cast %309 : vector<1x8x32xf32> to vector<8x32xf32>
    %311 = vector.shape_cast %307 : vector<8x32xf32> to vector<1x8x32xf32>
    tpu.vector_store %arg10[%308, %c0_87, %c0_88], %311 {strides = array<i32>} : memref<8x8x32xf32, #tpu.memory_space<vmem>>, vector<1x8x32xf32>,
    %c7_i32 = arith.constant 7 : i32
    %312 = arith.index_cast %c7_i32 : i32 to index
    %313 = memref.load %arg0[%312] : memref<8xf32, #tpu.memory_space<smem>>
    %cst_89 = arith.constant 5.000000e-01 : f32
    %314 = arith.mulf %cst_89, %313 : f32
    %cst_90 = arith.constant 0.166666672 : f32
    %315 = arith.mulf %313, %cst_90 : f32
    %cst_91 = arith.constant 2.000000e+00 : f32
    %316 = arith.mulf %cst_91, %315 : f32
    %cst_92 = arith.constant dense<0.000000e+00> : vector<8x32xf32>
    %317 = tpu.matmul %307, %0, %cst_92 {dimension_numbers = #tpu.dot_dimension_numbers<[1], [0], [0], [1], [0, 0, 1, 1], [], []>} : vector<8x32xf32>, vector<32x32xf32>, vector<8x32xf32> -> vector<8x32xf32>
    %318 = arith.addf %317, %4 : vector<8x32xf32>
    %319 = math.tanh %318 : vector<8x32xf32>
    %cst_93 = arith.constant dense<0.000000e+00> : vector<8x32xf32>
    %320 = tpu.matmul %319, %1, %cst_93 {dimension_numbers = #tpu.dot_dimension_numbers<[1], [0], [0], [1], [0, 0, 1, 1], [], []>} : vector<8x32xf32>, vector<32x32xf32>, vector<8x32xf32> -> vector<8x32xf32>
    %321 = arith.addf %320, %7 : vector<8x32xf32>
    %322 = vector.broadcast %315 : f32 to vector<8x32xf32>
    %323 = arith.mulf %322, %321 : vector<8x32xf32>
    %324 = arith.addf %307, %323 : vector<8x32xf32>
    %325 = vector.broadcast %314 : f32 to vector<8x32xf32>
    %326 = arith.mulf %325, %321 : vector<8x32xf32>
    %327 = arith.addf %307, %326 : vector<8x32xf32>
    %cst_94 = arith.constant dense<0.000000e+00> : vector<8x32xf32>
    %328 = tpu.matmul %327, %0, %cst_94 {dimension_numbers = #tpu.dot_dimension_numbers<[1], [0], [0], [1], [0, 0, 1, 1], [], []>} : vector<8x32xf32>, vector<32x32xf32>, vector<8x32xf32> -> vector<8x32xf32>
    %329 = arith.addf %328, %4 : vector<8x32xf32>
    %330 = math.tanh %329 : vector<8x32xf32>
    %cst_95 = arith.constant dense<0.000000e+00> : vector<8x32xf32>
    %331 = tpu.matmul %330, %1, %cst_95 {dimension_numbers = #tpu.dot_dimension_numbers<[1], [0], [0], [1], [0, 0, 1, 1], [], []>} : vector<8x32xf32>, vector<32x32xf32>, vector<8x32xf32> -> vector<8x32xf32>
    %332 = arith.addf %331, %7 : vector<8x32xf32>
    %333 = vector.broadcast %316 : f32 to vector<8x32xf32>
    %334 = arith.mulf %333, %332 : vector<8x32xf32>
    %335 = arith.addf %324, %334 : vector<8x32xf32>
    %336 = vector.broadcast %314 : f32 to vector<8x32xf32>
    %337 = arith.mulf %336, %332 : vector<8x32xf32>
    %338 = arith.addf %307, %337 : vector<8x32xf32>
    %cst_96 = arith.constant dense<0.000000e+00> : vector<8x32xf32>
    %339 = tpu.matmul %338, %0, %cst_96 {dimension_numbers = #tpu.dot_dimension_numbers<[1], [0], [0], [1], [0, 0, 1, 1], [], []>} : vector<8x32xf32>, vector<32x32xf32>, vector<8x32xf32> -> vector<8x32xf32>
    %340 = arith.addf %339, %4 : vector<8x32xf32>
    %341 = math.tanh %340 : vector<8x32xf32>
    %cst_97 = arith.constant dense<0.000000e+00> : vector<8x32xf32>
    %342 = tpu.matmul %341, %1, %cst_97 {dimension_numbers = #tpu.dot_dimension_numbers<[1], [0], [0], [1], [0, 0, 1, 1], [], []>} : vector<8x32xf32>, vector<32x32xf32>, vector<8x32xf32> -> vector<8x32xf32>
    %343 = arith.addf %342, %7 : vector<8x32xf32>
    %344 = vector.broadcast %316 : f32 to vector<8x32xf32>
    %345 = arith.mulf %344, %343 : vector<8x32xf32>
    %346 = arith.addf %335, %345 : vector<8x32xf32>
    %347 = vector.broadcast %313 : f32 to vector<8x32xf32>
    %348 = arith.mulf %347, %343 : vector<8x32xf32>
    %349 = arith.addf %307, %348 : vector<8x32xf32>
    %cst_98 = arith.constant dense<0.000000e+00> : vector<8x32xf32>
    %350 = tpu.matmul %349, %0, %cst_98 {dimension_numbers = #tpu.dot_dimension_numbers<[1], [0], [0], [1], [0, 0, 1, 1], [], []>} : vector<8x32xf32>, vector<32x32xf32>, vector<8x32xf32> -> vector<8x32xf32>
    %351 = arith.addf %350, %4 : vector<8x32xf32>
    %352 = math.tanh %351 : vector<8x32xf32>
    %cst_99 = arith.constant dense<0.000000e+00> : vector<8x32xf32>
    %353 = tpu.matmul %352, %1, %cst_99 {dimension_numbers = #tpu.dot_dimension_numbers<[1], [0], [0], [1], [0, 0, 1, 1], [], []>} : vector<8x32xf32>, vector<32x32xf32>, vector<8x32xf32> -> vector<8x32xf32>
    %354 = arith.addf %353, %7 : vector<8x32xf32>
    %355 = vector.broadcast %315 : f32 to vector<8x32xf32>
    %356 = arith.mulf %355, %354 : vector<8x32xf32>
    %357 = arith.addf %346, %356 : vector<8x32xf32>
    %358 = arith.index_cast %c7_i32 : i32 to index
    %c0_100 = arith.constant 0 : index
    %c0_101 = arith.constant 0 : index
    %359 = vector.load %arg10[%358, %c0_100, %c0_101] : memref<8x8x32xf32, #tpu.memory_space<vmem>>, vector<1x8x32xf32>
    %360 = vector.shape_cast %359 : vector<1x8x32xf32> to vector<8x32xf32>
    %361 = vector.shape_cast %357 : vector<8x32xf32> to vector<1x8x32xf32>
    tpu.vector_store %arg10[%358, %c0_100, %c0_101], %361 {strides = array<i32>} : memref<8x8x32xf32, #tpu.memory_space<vmem>>, vector<1x8x32xf32>,
    %c7_i32_102 = arith.constant 7 : i32
    %c0_103 = arith.constant 0 : index
    %c0_104 = arith.constant 0 : index
    %c0_105 = arith.constant 0 : index
    %362 = vector.load %arg10[%c0_103, %c0_104, %c0_105] : memref<8x8x32xf32, #tpu.memory_space<vmem>>, vector<8x8x32xf32>
    %363 = vector.shape_cast %362 : vector<8x8x32xf32> to vector<64x32xf32>
    %c0_106 = arith.constant 0 : index
    %c0_107 = arith.constant 0 : index
    %364 = vector.load %arg6[%c0_106, %c0_107] : memref<32x32xf32, #tpu.memory_space<vmem>>, vector<32x32xf32>
    %cst_108 = arith.constant dense<0.000000e+00> : vector<64x32xf32>
    %365 = tpu.matmul %363, %364, %cst_108 {dimension_numbers = #tpu.dot_dimension_numbers<[1], [0], [0], [1], [0, 0, 1, 1], [], []>} : vector<64x32xf32>, vector<32x32xf32>, vector<64x32xf32> -> vector<64x32xf32>
    %c0_109 = arith.constant 0 : index
    %c0_110 = arith.constant 0 : index
    %366 = vector.load %arg7[%c0_109, %c0_110] : memref<1x32xf32, #tpu.memory_space<vmem>>, vector<1x32xf32>
    %367 = vector.broadcast %366 : vector<1x32xf32> to vector<64x32xf32>
    %368 = arith.addf %365, %367 : vector<64x32xf32>
    %369 = math.tanh %368 : vector<64x32xf32>
    %c0_111 = arith.constant 0 : index
    %c0_112 = arith.constant 0 : index
    %370 = vector.load %arg8[%c0_111, %c0_112] : memref<32x32xf32, #tpu.memory_space<vmem>>, vector<32x32xf32>
    %cst_113 = arith.constant dense<0.000000e+00> : vector<64x32xf32>
    %371 = tpu.matmul %369, %370, %cst_113 {dimension_numbers = #tpu.dot_dimension_numbers<[1], [0], [0], [1], [0, 0, 1, 1], [], []>} : vector<64x32xf32>, vector<32x32xf32>, vector<64x32xf32> -> vector<64x32xf32>
    %c0_114 = arith.constant 0 : index
    %c0_115 = arith.constant 0 : index
    %372 = vector.load %arg9[%c0_114, %c0_115] : memref<1x32xf32, #tpu.memory_space<vmem>>, vector<1x32xf32>
    %373 = vector.broadcast %372 : vector<1x32xf32> to vector<64x32xf32>
    %374 = arith.addf %371, %373 : vector<64x32xf32>
    %cst_116 = arith.constant 0.000000e+00 : f32
    %375 = vector.broadcast %cst_116 : f32 to vector<64x32xf32>
    %376 = arith.maximumf %374, %375 : vector<64x32xf32>
    %377 = vector.broadcast %cst_116 : f32 to vector<64x32xf32>
    %378 = arith.subf %374, %377 : vector<64x32xf32>
    %379 = arith.cmpf one, %378, %378 : vector<64x32xf32>
    %380 = vector.broadcast %cst_116 : f32 to vector<64x32xf32>
    %381 = arith.addf %374, %380 : vector<64x32xf32>
    %382 = math.absf %378 : vector<64x32xf32>
    %cst_117 = arith.constant 0.000000e+00 : f32
    %383 = vector.broadcast %cst_117 : f32 to vector<64x32xf32>
    %384 = arith.subf %383, %382 : vector<64x32xf32>
    %385 = math.exp %384 : vector<64x32xf32>
    %386 = math.log1p %385 : vector<64x32xf32>
    %387 = arith.addf %376, %386 : vector<64x32xf32>
    %388 = arith.select %379, %381, %387 : vector<64x32xi1>, vector<64x32xf32>
    %cst_118 = arith.constant 9.99999997E-7 : f32
    %389 = vector.broadcast %cst_118 : f32 to vector<64x32xf32>
    %390 = arith.addf %388, %389 : vector<64x32xf32>
    %391 = vector.shape_cast %390 : vector<64x32xf32> to vector<8x8x32xf32>
    %c0_119 = arith.constant 0 : index
    %c0_120 = arith.constant 0 : index
    %c0_121 = arith.constant 0 : index
    %392 = vector.load %arg11[%c0_119, %c0_120, %c0_121] : memref<8x8x32xf32, #tpu.memory_space<vmem>>, vector<8x8x32xf32>
    tpu.vector_store %arg11[%c0_119, %c0_120, %c0_121], %391 {strides = array<i32>} : memref<8x8x32xf32, #tpu.memory_space<vmem>>, vector<8x8x32xf32>,
    return
  }
}

</mosaic_0001>

<bundles_post_ra>
// kernel: aleotoric_wrapper_forward.1
= control target key start
LH: loop header
LB: loop body
LE: loop exit
PB: predicated region body
PF: predicated region fallthrough
CT: control target
= control target key end

     0   :  { %17 = vsyncpa [#allocation5], 0  ;;  %s7357_s0 = inlined_call_operand.vmem [shape: f32[8], index: 0, kind: input, shape index: {}]   ;;  %s7358_s1 = inlined_call_operand.hbm [shape: f32[8,32], index: 1, kind: input, shape index: {}]   ;;  %s7359_s2 = inlined_call_operand.hbm [shape: f32[32,32], index: 2, kind: input, shape index: {}]   ;;  %s7360_s3 = inlined_call_operand.vmem [shape: f32[1,32], index: 3, kind: input, shape index: {}]   ;;  %s7361_s4 = inlined_call_operand.hbm [shape: f32[32,32], index: 4, kind: input, shape index: {}]   ;;  %s7362_s5 = inlined_call_operand.vmem [shape: f32[1,32], index: 5, kind: input, shape index: {}]   ;;  %s7363_s6 = inlined_call_operand.hbm [shape: f32[32,32], index: 6, kind: input, shape index: {}]   ;;  %s7364_s7 = inlined_call_operand.vmem [shape: f32[1,32], index: 7, kind: input, shape index: {}]   ;;  %s7365_s8 = inlined_call_operand.hbm [shape: f32[32,32], index: 8, kind: input, shape index: {}]   ;;  %s7366_s9 = inlined_call_operand.vmem [shape: f32[1,32], index: 9, kind: input, shape index: {}]   ;;  %s7367_s10 = inlined_call_operand.hbm [shape: f32[8,8,32], index: 10, kind: output, shape index: {0}]   ;;  %s7368_s11 = inlined_call_operand.hbm [shape: f32[8,8,32], index: 11, kind: output, shape index: {1}]  }
   0x1   :  { %18 = vsyncpa [#allocation3], 0 }
   0x2   :  { %19 = vsyncpa [#allocation8], 0 }
   0x3   :  { %20 = vsyncpa [#allocation11], 0 }
   0x4   :  { %21 = vsyncpa [#allocation4], 0 }
   0x5   :  { %22 = vsyncpa [#allocation15], 0  ;;  %s6252_s17 = smov [#allocation7]  }
   0x6   :  { %s48_s18 = sshll.u32 %s6252_s17, 4  ;;  %s49_s18 = int_to_ptr.vmem [resolvable:$true] %s48_s18 }
   0x7   :  { %s6096_s19 = scalar_lea.vmem %s49_s18, 512  ;;  %p6101_p1 = scmp.lt.s32.totalorder %s49_s18, %s49_s18 }
   0x8   :  { %p6097_p0 = scmp.ne.s32.totalorder %s49_s18, %s6096_s19  ;;  %p6102_p2 = scmp.lt.s32.totalorder %s6096_s19, %s6096_s19 }
   0xa   :  { %p6103_p3 = por %p6102_p2, %p6101_p1 }
   0xc   :  { %p6104_p4 = pnand %p6103_p3, %p6097_p0 }
   0xe   :  { %6107 = shalt.err (!%p6104_p4)
}
   0xf   :  { %s6253_s20 = smov 128   ;;  %s6254_s21 = smov 8  }
  0x10   :  { %54 = dma.hbm_to_vmem [thread:$0]  %s7359_s2, 512, %s49_s18, [#allocation8], %s6253_s20, %s6253_s20, %s6254_s21  }
  0x11   :  { %s6255_s24 = smov [#allocation10]   ;;  %s29_s28 = sshll.u32 %s7357_s0, 4  ;;  %s30_s28 = int_to_ptr.vmem [resolvable:$true] %s29_s28 }
  0x12   :  { %s76_s25 = sshll.u32 %s6255_s24, 4  ;;  %s77_s25 = int_to_ptr.vmem [resolvable:$true] %s76_s25 }
  0x13   :  { %s6116_s29 = scalar_lea.vmem %s77_s25, 512  ;;  %p6121_p6 = scmp.lt.s32.totalorder %s77_s25, %s77_s25 }
  0x14   :  { %p6117_p5 = scmp.ne.s32.totalorder %s77_s25, %s6116_s29  ;;  %p6122_p7 = scmp.lt.s32.totalorder %s6116_s29, %s6116_s29 }
  0x16   :  { %p6123_p8 = por %p6122_p7, %p6121_p6 }
  0x18   :  { %p6124_p9 = pnand %p6123_p8, %p6117_p5 }
  0x1a   :  { %6127 = shalt.err (!%p6124_p9)
}
  0x1b   :  { %82 = dma.hbm_to_vmem [thread:$0]  %s7363_s6, 512, %s77_s25, [#allocation11], %s6253_s20, %s6253_s20, %s6254_s21  }
  0x1c   :  { %s6128_s12 = scalar_lea.vmem %s30_s28, 16  ;;  %p6133_p11 = scmp.lt.s32.totalorder %s30_s28, %s30_s28 }
  0x1d   :  { %p6129_p10 = scmp.ne.s32.totalorder %s30_s28, %s6128_s12  ;;  %p6134_p12 = scmp.lt.s32.totalorder %s6128_s12, %s6128_s12 }
  0x1f   :  { %p6135_p13 = por %p6134_p12, %p6133_p11 }
  0x21   :  { %p6136_p0 = pnand %p6135_p13, %p6129_p10 }
  0x23   :  { %6139 = shalt.err (!%p6136_p0)
}
  0x24   :  { %s6256_s0 = smov [#allocation2]   ;;  %s6257_s13 = smov [#allocation6]  }
  0x25   :  { %32 = dma.vmem_to_smem %s30_s28, 16, %s6256_s0, [#allocation5]  }
  0x26   :  { %s39_s14 = sshll.u32 %s6257_s13, 4  ;;  %s6258_s15 = smov [#allocation9]   ;;  %s40_s14 = int_to_ptr.vmem [resolvable:$true] %s39_s14 }
  0x27   :  { %s62_s16 = sshll.u32 %s6258_s15, 4  ;;  %s6148_s17 = scalar_lea.vmem %s40_s14, 128  ;;  %s63_s16 = int_to_ptr.vmem [resolvable:$true] %s62_s16 }
  0x28   :  { %p6149_p1 = scmp.ne.s32.totalorder %s40_s14, %s6148_s17  ;;  %p6153_p2 = scmp.lt.s32.totalorder %s40_s14, %s40_s14 }
  0x29   :  { %p6154_p3 = scmp.lt.s32.totalorder %s6148_s17, %s6148_s17 }
  0x2b   :  { %p6155_p4 = por %p6154_p3, %p6153_p2 }
  0x2d   :  { %p6156_p5 = pnand %p6155_p4, %p6149_p1 }
  0x2f   :  { %6159 = shalt.err (!%p6156_p5)
}
  0x30   :  { %42 = dma.hbm_to_vmem [thread:$0]  %s7358_s1, 128, %s40_s14, [#allocation3]  }
  0x31   :  { %s6168_s19 = scalar_lea.vmem %s63_s16, 512  ;;  %p6173_p7 = scmp.lt.s32.totalorder %s63_s16, %s63_s16 }
  0x32   :  { %p6169_p6 = scmp.ne.s32.totalorder %s63_s16, %s6168_s19  ;;  %p6174_p8 = scmp.lt.s32.totalorder %s6168_s19, %s6168_s19 }
  0x34   :  { %p6175_p9 = por %p6174_p8, %p6173_p7 }
  0x36   :  { %p6176_p10 = pnand %p6175_p9, %p6169_p6 }
  0x38   :  { %6179 = shalt.err (!%p6176_p10)
}
  0x39   :  { %68 = dma.hbm_to_vmem [thread:$0]  %s7361_s4, 512, %s63_s16, [#allocation8], %s6253_s20, %s6253_s20, %s6254_s21  }
  0x3a   :  { %s6259_s24 = smov [#allocation12]  }
  0x3b   :  { %s90_s25 = sshll.u32 %s6259_s24, 4  ;;  %s91_s25 = int_to_ptr.vmem [resolvable:$true] %s90_s25 }
  0x3c   :  { %s6188_s26 = scalar_lea.vmem %s91_s25, 512  ;;  %p6193_p12 = scmp.lt.s32.totalorder %s91_s25, %s91_s25 }
  0x3d   :  { %p6189_p11 = scmp.ne.s32.totalorder %s91_s25, %s6188_s26  ;;  %p6194_p13 = scmp.lt.s32.totalorder %s6188_s26, %s6188_s26 }
  0x3f   :  { %p6195_p0 = por %p6194_p13, %p6193_p12 }
  0x41   :  { %p6196_p1 = pnand %p6195_p0, %p6189_p11 }
  0x43   :  { %6199 = shalt.err (!%p6196_p1)
}
  0x44   :  { %96 = dma.hbm_to_vmem [thread:$0]  %s7365_s8, 512, %s91_s25, [#allocation11], %s6253_s20, %s6253_s20, %s6254_s21  }
  0x45   :  { %6240 = dma.done.wait [#allocation5], 16  }
  0x46   :  { %6241 = vsyncadd [#allocation5], 4294967280 }
  0x47   :  { %6242 = dma.done.wait [#allocation3], 128  }
  0x48   :  { %6243 = vsyncadd [#allocation3], 4294967168 }
  0x49   :  { %6244 = dma.done.wait [#allocation8], 1024  }
  0x4a   :  { %6245 = vsyncadd [#allocation8], 4294966272 }
  0x4b   :  { %6246 = dma.done.wait [#allocation11], 1024  }
  0x4c   :  { %6247 = vsyncadd [#allocation11], 4294966272 }
  0x4d   :  { %117 = sfence }
  0x4e   :  { %v6354_v0 = vld [vmem:[#allocation7 + $0x18] sm:$0xff]  ;;  %v6260_v1 = vmov 0.0   ;;  %v6357_v2 = vld [vmem:[#allocation7 + $0x10] sm:$0xff]  ;;  %vm6261_vm0 = vmmov 0   ;;  %vm141_vm1 = vcmask 261120   ;;  %v6368_v4 = vld [vmem:[#allocation7 + $0x8] sm:$0xff] }
  0x4f   :  { %5306 = vmatprep.subr.mxu0 %v6260_v1  ;;  %5314 = vmatprep.mubr.msk.f32.mxu0 %vm6261_vm0, %v6260_v1  ;;  %v6361_v3 = vld [vmem:[#allocation6] sm:$0xff]  ;;  %v6374_v5 = vld [vmem:[#allocation7] sm:$0xff]  ;;  %v6394_v7 = vld [vmem:[#allocation9 + $0x10] sm:$0xff]  ;;  %s6425_s28 = sld [smem:[#allocation2 + $0x1]] }
  0x50   :  { %5307 = vmatpush3.msra.mxu0 %v6354_v0  ;;  %142 = vst.msk [vmem:[#allocation13] sm:$0xff] %vm141_vm1, %v6361_v3  ;;  %5317 = vmatprep.subr.mxu1 %v6260_v1  ;;  %v6392_v6 = vld [vmem:[#allocation9 + $0x18] sm:$0xff]  ;;  %v6398_v8 = vld [vmem:[#allocation9 + $0x8] sm:$0xff]  ;;  %v6402_v9 = vld [vmem:[#allocation9] sm:$0xff]  ;;  %s6547_s13 = sld [smem:[#allocation2 + $0x2]] }
  0x51   :  { %5308 = vmatprep.subr.mxu0 %v6260_v1  ;;  %5325 = vmatprep.mubr.msk.f32.mxu1 %vm6261_vm0, %v6260_v1  ;;  %v6411_v10 = vld [vmem:[%s7360_s3] ss:$0 sm:$0xff]  ;;  %s6664_s17 = sld [smem:[#allocation2 + $0x3]] }
  0x52   :  { %5309 = vmatpush3.msra.mxu0 %v6357_v2  ;;  %5318 = vmatpush3.msra.mxu1 %v6392_v6  ;;  %v6431_v15 = vld [vmem:[%s7362_s5] ss:$0 sm:$0xff]  ;;  %s6781_s22 = sld [smem:[#allocation2 + $0x4]] }
  0x53   :  { %5310 = vmatprep.subr.mxu0 %v6260_v1  ;;  %5319 = vmatprep.subr.mxu1 %v6260_v1 }
  0x54   :  { %5311 = vmatpush3.msra.mxu0 %v6368_v4  ;;  %5320 = vmatpush3.msra.mxu1 %v6394_v7 }
  0x55   :  { %5312 = vmatprep.subr.mxu0 %v6260_v1  ;;  %5321 = vmatprep.subr.mxu1 %v6260_v1  ;;  %s144_s29 = smul.f32 0.5, %s6425_s28  ;;  %v601_v42 = vstv %s6425_s28 }
  0x56   :  { %5313 = vmatpush3.msra.mxu0 %v6374_v5  ;;  %5322 = vmatpush3.msra.mxu1 %v6398_v8  ;;  %s145_s12 = smul.f32 0.16666667, %s6425_s28 }
  0x57   :  { %5315 = vmatmul.mubr.msk.f32.vlgmr.msra.gmra.mxu0 %vm141_vm1, %v6361_v3  ;;  %5328 = vmatprep.subr.mxu0 %v6260_v1  ;;  %v297_v17 = vstv %s144_s29  ;;  %s756_s14 = smul.f32 0.5, %s6547_s13  ;;  %s7041_s29 = sld [smem:[#allocation2 + $0x6]] }
  0x58   :  { %5329 = vmatpush3.msra.mxu0 %v6354_v0  ;;  %5336 = vmatprep.mubr.msk.f32.mxu0 %vm6261_vm0, %v6260_v1  ;;  %v6459_v26 = vstv %s145_s12  ;;  %s6461_s0 = smul.f32 2.0, %s145_s12 }
  0x59   :  { %5330 = vmatprep.subr.mxu0 %v6260_v1  ;;  %5323 = vmatprep.subr.mxu1 %v6260_v1  ;;  %v909_v63 = vstv %s756_s14  ;;  %s757_s15 = smul.f32 0.16666667, %s6547_s13 }
  0x5a   :  { %5331 = vmatpush3.msra.mxu0 %v6357_v2  ;;  %5324 = vmatpush3.msra.mxu1 %v6402_v9  ;;  %v447_v29 = vstv %s6461_s0  ;;  %s1368_s6 = smul.f32 0.5, %s6664_s17  ;;  %s7158_s0 = sld [smem:[#allocation2 + $0x7]] }
  0x5b   :  { %5332 = vmatprep.subr.mxu0 %v6260_v1  ;;  %5339 = vmatprep.subr.mxu1 %v6260_v1  ;;  %s6578_s16 = smul.f32 2.0, %s757_s15 }
  0x5c   :  { %5333 = vmatpush3.msra.mxu0 %v6368_v4  ;;  %s1369_s18 = smul.f32 0.16666667, %s6664_s17 }
  0x5d   :  { %5334 = vmatprep.subr.mxu0 %v6260_v1  ;;  %s1980_s23 = smul.f32 0.5, %s6781_s22 }
  0x5e   :  { %5335 = vmatpush3.msra.mxu0 %v6374_v5  ;;  %s6695_s19 = smul.f32 2.0, %s1369_s18 }
  0x5f   :  { %5350 = vmatprep.subr.mxu0 %v6260_v1  ;;  %s1981_s24 = smul.f32 0.16666667, %s6781_s22 }
  0x60   :  { %s3204_s30 = smul.f32 0.5, %s7041_s29 }
  0x61   :  { %s6812_s25 = smul.f32 2.0, %s1981_s24 }
  0x62   :  { %s3205_s2 = smul.f32 0.16666667, %s7041_s29 }
  0x63   :  { %s3817_s14 = smul.f32 0.16666667, %s7158_s0 }
  0x64   :  { %s7072_s12 = smul.f32 2.0, %s3205_s2 }
 0x117   :  { %v216_v11 = vpop.f32.mrf.mxu0 }
 0x118   :  { %v217_v12 = vadd.f32 %v6411_v10, %v216_v11 }
 0x119   :  { %v5316_v13 = vpop.f32.mrf.mxu0 }
 0x11a   :  { %5974 = vtanh.f32 %v217_v12 }
 0x127   :  { %v5975_v14 = vpop.eup %5974 }
 0x128   :  { %5326 = vmatmul.mubr.msk.f32.vlgmr.msra.gmra.mxu1 %vm141_vm1, %v5975_v14 }
 0x129   :  { %5340 = vmatpush3.msra.mxu1 %v6392_v6  ;;  %5347 = vmatprep.mubr.msk.f32.mxu1 %vm6261_vm0, %v6260_v1 }
 0x12a   :  { %5341 = vmatprep.subr.mxu1 %v6260_v1 }
 0x12b   :  { %5342 = vmatpush3.msra.mxu1 %v6394_v7 }
 0x12c   :  { %5343 = vmatprep.subr.mxu1 %v6260_v1 }
 0x12d   :  { %5344 = vmatpush3.msra.mxu1 %v6398_v8 }
 0x12e   :  { %5345 = vmatprep.subr.mxu1 %v6260_v1 }
 0x12f   :  { %5346 = vmatpush3.msra.mxu1 %v6402_v9 }
 0x130   :  { %5361 = vmatprep.subr.mxu1 %v6260_v1 }
 0x1e8   :  { %v290_v16 = vpop.f32.mrf.mxu1 }
 0x1e9   :  { %v291_v18 = vadd.f32 %v6431_v15, %v290_v16 }
 0x1ea   :  { %v5327_v19 = vpop.f32.mrf.mxu1 }
 0x1eb   :  { %v298_v20 = vmul.f32 %v297_v17, %v291_v18  ;;  %v295_v27 = vmul.f32 %v6459_v26, %v291_v18  ;;  %v6576_v19 = vstv %s757_s15  ;;  %s7189_s15 = smul.f32 2.0, %s3817_s14 }
 0x1ed   :  { %v299_v21 = vadd.f32 %v298_v20, %v6361_v3  ;;  %v296_v32 = vadd.f32 %v295_v27, %v6361_v3 }
 0x1ef   :  { %5337 = vmatmul.mubr.msk.f32.vlgmr.msra.gmra.mxu0 %vm141_vm1, %v299_v21 }
 0x1f0   :  { %5351 = vmatpush3.msra.mxu0 %v6354_v0  ;;  %5358 = vmatprep.mubr.msk.f32.mxu0 %vm6261_vm0, %v6260_v1 }
 0x1f1   :  { %5352 = vmatprep.subr.mxu0 %v6260_v1 }
 0x1f2   :  { %5353 = vmatpush3.msra.mxu0 %v6357_v2 }
 0x1f3   :  { %5354 = vmatprep.subr.mxu0 %v6260_v1 }
 0x1f4   :  { %5355 = vmatpush3.msra.mxu0 %v6368_v4 }
 0x1f5   :  { %5356 = vmatprep.subr.mxu0 %v6260_v1 }
 0x1f6   :  { %5357 = vmatpush3.msra.mxu0 %v6374_v5 }
 0x1f7   :  { %5372 = vmatprep.subr.mxu0 %v6260_v1 }
 0x2af   :  { %v369_v22 = vpop.f32.mrf.mxu0 }
 0x2b0   :  { %v370_v23 = vadd.f32 %v6411_v10, %v369_v22  ;;  %v1059_v22 = vstv %s6578_s16 }
 0x2b1   :  { %v5338_v24 = vpop.f32.mrf.mxu0 }
 0x2b2   :  { %5976 = vtanh.f32 %v370_v23 }
 0x2bf   :  { %v5977_v25 = vpop.eup %5976 }
 0x2c0   :  { %5348 = vmatmul.mubr.msk.f32.vlgmr.msra.gmra.mxu1 %vm141_vm1, %v5977_v25 }
 0x2c1   :  { %5362 = vmatpush3.msra.mxu1 %v6392_v6  ;;  %5369 = vmatprep.mubr.msk.f32.mxu1 %vm6261_vm0, %v6260_v1 }
 0x2c2   :  { %5363 = vmatprep.subr.mxu1 %v6260_v1 }
 0x2c3   :  { %5364 = vmatpush3.msra.mxu1 %v6394_v7 }
 0x2c4   :  { %5365 = vmatprep.subr.mxu1 %v6260_v1 }
 0x2c5   :  { %5366 = vmatpush3.msra.mxu1 %v6398_v8 }
 0x2c6   :  { %5367 = vmatprep.subr.mxu1 %v6260_v1 }
 0x2c7   :  { %5368 = vmatpush3.msra.mxu1 %v6402_v9 }
 0x2c8   :  { %5383 = vmatprep.subr.mxu1 %v6260_v1 }
 0x380   :  { %v443_v28 = vpop.f32.mrf.mxu1 }
 0x381   :  { %v444_v30 = vadd.f32 %v6431_v15, %v443_v28 }
 0x382   :  { %v5349_v31 = vpop.f32.mrf.mxu1 }
 0x383   :  { %v448_v33 = vmul.f32 %v447_v29, %v444_v30  ;;  %v450_v34 = vmul.f32 %v444_v30, %v297_v17 }
 0x385   :  { %v449_v35 = vadd.f32 %v448_v33, %v296_v32  ;;  %v451_v36 = vadd.f32 %v450_v34, %v6361_v3 }
 0x387   :  { %5359 = vmatmul.mubr.msk.f32.vlgmr.msra.gmra.mxu0 %vm141_vm1, %v451_v36 }
 0x388   :  { %5373 = vmatpush3.msra.mxu0 %v6354_v0  ;;  %5380 = vmatprep.mubr.msk.f32.mxu0 %vm6261_vm0, %v6260_v1 }
 0x389   :  { %5374 = vmatprep.subr.mxu0 %v6260_v1 }
 0x38a   :  { %5375 = vmatpush3.msra.mxu0 %v6357_v2 }
 0x38b   :  { %5376 = vmatprep.subr.mxu0 %v6260_v1 }
 0x38c   :  { %5377 = vmatpush3.msra.mxu0 %v6368_v4 }
 0x38d   :  { %5378 = vmatprep.subr.mxu0 %v6260_v1 }
 0x38e   :  { %5379 = vmatpush3.msra.mxu0 %v6374_v5 }
 0x38f   :  { %5394 = vmatprep.subr.mxu0 %v6260_v1 }
 0x447   :  { %v521_v37 = vpop.f32.mrf.mxu0 }
 0x448   :  { %v522_v38 = vadd.f32 %v6411_v10, %v521_v37 }
 0x449   :  { %v5360_v39 = vpop.f32.mrf.mxu0 }
 0x44a   :  { %5978 = vtanh.f32 %v522_v38 }
 0x457   :  { %v5979_v40 = vpop.eup %5978 }
 0x458   :  { %5370 = vmatmul.mubr.msk.f32.vlgmr.msra.gmra.mxu1 %vm141_vm1, %v5979_v40 }
 0x459   :  { %5384 = vmatpush3.msra.mxu1 %v6392_v6  ;;  %5391 = vmatprep.mubr.msk.f32.mxu1 %vm6261_vm0, %v6260_v1 }
 0x45a   :  { %5385 = vmatprep.subr.mxu1 %v6260_v1 }
 0x45b   :  { %5386 = vmatpush3.msra.mxu1 %v6394_v7 }
 0x45c   :  { %5387 = vmatprep.subr.mxu1 %v6260_v1 }
 0x45d   :  { %5388 = vmatpush3.msra.mxu1 %v6398_v8 }
 0x45e   :  { %5389 = vmatprep.subr.mxu1 %v6260_v1 }
 0x45f   :  { %5390 = vmatpush3.msra.mxu1 %v6402_v9 }
 0x460   :  { %5405 = vmatprep.subr.mxu1 %v6260_v1 }
 0x518   :  { %v595_v41 = vpop.f32.mrf.mxu1 }
 0x519   :  { %v596_v43 = vadd.f32 %v6431_v15, %v595_v41 }
 0x51a   :  { %v5371_v44 = vpop.f32.mrf.mxu1 }
 0x51b   :  { %v599_v45 = vmul.f32 %v596_v43, %v447_v29  ;;  %v602_v46 = vmul.f32 %v601_v42, %v596_v43 }
 0x51d   :  { %v600_v47 = vadd.f32 %v599_v45, %v449_v35  ;;  %v603_v48 = vadd.f32 %v602_v46, %v6361_v3  ;;  %v1213_v35 = vstv %s6547_s13  ;;  %s3816_s13 = smul.f32 0.5, %s7158_s0 }
 0x51f   :  { %5381 = vmatmul.mubr.msk.f32.vlgmr.msra.gmra.mxu0 %vm141_vm1, %v603_v48 }
 0x520   :  { %5395 = vmatpush3.msra.mxu0 %v6354_v0  ;;  %5402 = vmatprep.mubr.msk.f32.mxu0 %vm6261_vm0, %v6260_v1 }
 0x521   :  { %5396 = vmatprep.subr.mxu0 %v6260_v1 }
 0x522   :  { %5397 = vmatpush3.msra.mxu0 %v6357_v2 }
 0x523   :  { %5398 = vmatprep.subr.mxu0 %v6260_v1 }
 0x524   :  { %5399 = vmatpush3.msra.mxu0 %v6368_v4 }
 0x525   :  { %5400 = vmatprep.subr.mxu0 %v6260_v1 }
 0x526   :  { %5401 = vmatpush3.msra.mxu0 %v6374_v5 }
 0x527   :  { %5416 = vmatprep.subr.mxu0 %v6260_v1 }
 0x5df   :  { %v673_v49 = vpop.f32.mrf.mxu0 }
 0x5e0   :  { %v674_v50 = vadd.f32 %v6411_v10, %v673_v49 }
 0x5e1   :  { %v5382_v51 = vpop.f32.mrf.mxu0 }
 0x5e2   :  { %5980 = vtanh.f32 %v674_v50 }
 0x5ef   :  { %v5981_v52 = vpop.eup %5980 }
 0x5f0   :  { %5392 = vmatmul.mubr.msk.f32.vlgmr.msra.gmra.mxu1 %vm141_vm1, %v5981_v52 }
 0x5f1   :  { %5406 = vmatpush3.msra.mxu1 %v6392_v6  ;;  %5413 = vmatprep.mubr.msk.f32.mxu1 %vm6261_vm0, %v6260_v1 }
 0x5f2   :  { %5407 = vmatprep.subr.mxu1 %v6260_v1 }
 0x5f3   :  { %5408 = vmatpush3.msra.mxu1 %v6394_v7 }
 0x5f4   :  { %5409 = vmatprep.subr.mxu1 %v6260_v1 }
 0x5f5   :  { %5410 = vmatpush3.msra.mxu1 %v6398_v8 }
 0x5f6   :  { %5411 = vmatprep.subr.mxu1 %v6260_v1 }
 0x5f7   :  { %5412 = vmatpush3.msra.mxu1 %v6402_v9 }
 0x5f8   :  { %5427 = vmatprep.subr.mxu1 %v6260_v1 }
 0x6b0   :  { %v747_v53 = vpop.f32.mrf.mxu1 }
 0x6b1   :  { %v748_v54 = vadd.f32 %v6431_v15, %v747_v53 }
 0x6b2   :  { %v5393_v55 = vpop.f32.mrf.mxu1 }
 0x6b3   :  { %v751_v56 = vmul.f32 %v748_v54, %v6459_v26 }
 0x6b5   :  { %v6519_v57 = vadd.f32 %v751_v56, %v600_v47  ;;  %v1521_v56 = vstv %s1368_s6 }
 0x6b7   :  { %754 = vst.msk [vmem:[#allocation13 + $0x8] sm:$0xff] %vm141_vm1, %v6519_v57  ;;  %5403 = vmatmul.mubr.msk.f32.vlgmr.msra.gmra.mxu0 %vm141_vm1, %v6519_v57 }
 0x6b8   :  { %5417 = vmatpush3.msra.mxu0 %v6354_v0  ;;  %5424 = vmatprep.mubr.msk.f32.mxu0 %vm6261_vm0, %v6260_v1 }
 0x6b9   :  { %5418 = vmatprep.subr.mxu0 %v6260_v1 }
 0x6ba   :  { %5419 = vmatpush3.msra.mxu0 %v6357_v2 }
 0x6bb   :  { %5420 = vmatprep.subr.mxu0 %v6260_v1 }
 0x6bc   :  { %5421 = vmatpush3.msra.mxu0 %v6368_v4 }
 0x6bd   :  { %5422 = vmatprep.subr.mxu0 %v6260_v1 }
 0x6be   :  { %5423 = vmatpush3.msra.mxu0 %v6374_v5 }
 0x6bf   :  { %5438 = vmatprep.subr.mxu0 %v6260_v1 }
 0x777   :  { %v828_v58 = vpop.f32.mrf.mxu0 }
 0x778   :  { %v829_v59 = vadd.f32 %v6411_v10, %v828_v58 }
 0x779   :  { %v5404_v60 = vpop.f32.mrf.mxu0 }
 0x77a   :  { %5982 = vtanh.f32 %v829_v59 }
 0x787   :  { %v5983_v61 = vpop.eup %5982 }
 0x788   :  { %5414 = vmatmul.mubr.msk.f32.vlgmr.msra.gmra.mxu1 %vm141_vm1, %v5983_v61 }
 0x789   :  { %5428 = vmatpush3.msra.mxu1 %v6392_v6  ;;  %5435 = vmatprep.mubr.msk.f32.mxu1 %vm6261_vm0, %v6260_v1 }
 0x78a   :  { %5429 = vmatprep.subr.mxu1 %v6260_v1 }
 0x78b   :  { %5430 = vmatpush3.msra.mxu1 %v6394_v7 }
 0x78c   :  { %5431 = vmatprep.subr.mxu1 %v6260_v1 }
 0x78d   :  { %5432 = vmatpush3.msra.mxu1 %v6398_v8 }
 0x78e   :  { %5433 = vmatprep.subr.mxu1 %v6260_v1 }
 0x78f   :  { %5434 = vmatpush3.msra.mxu1 %v6402_v9 }
 0x790   :  { %5449 = vmatprep.subr.mxu1 %v6260_v1 }
 0x848   :  { %v902_v62 = vpop.f32.mrf.mxu1 }
 0x849   :  { %v903_v3 = vadd.f32 %v6431_v15, %v902_v62 }
 0x84a   :  { %v5415_v11 = vpop.f32.mrf.mxu1 }
 0x84b   :  { %v910_v12 = vmul.f32 %v909_v63, %v903_v3  ;;  %v907_v20 = vmul.f32 %v6576_v19, %v903_v3  ;;  %v6693_v11 = vstv %s1369_s18 }
 0x84d   :  { %v911_v13 = vadd.f32 %v910_v12, %v6519_v57  ;;  %v908_v25 = vadd.f32 %v907_v20, %v6519_v57 }
 0x84f   :  { %5425 = vmatmul.mubr.msk.f32.vlgmr.msra.gmra.mxu0 %vm141_vm1, %v911_v13 }
 0x850   :  { %5439 = vmatpush3.msra.mxu0 %v6354_v0  ;;  %5446 = vmatprep.mubr.msk.f32.mxu0 %vm6261_vm0, %v6260_v1 }
 0x851   :  { %5440 = vmatprep.subr.mxu0 %v6260_v1 }
 0x852   :  { %5441 = vmatpush3.msra.mxu0 %v6357_v2 }
 0x853   :  { %5442 = vmatprep.subr.mxu0 %v6260_v1 }
 0x854   :  { %5443 = vmatpush3.msra.mxu0 %v6368_v4 }
 0x855   :  { %5444 = vmatprep.subr.mxu0 %v6260_v1 }
 0x856   :  { %5445 = vmatpush3.msra.mxu0 %v6374_v5 }
 0x857   :  { %5460 = vmatprep.subr.mxu0 %v6260_v1 }
 0x90f   :  { %v981_v14 = vpop.f32.mrf.mxu0 }
 0x910   :  { %v982_v16 = vadd.f32 %v6411_v10, %v981_v14  ;;  %v1671_v14 = vstv %s6695_s19 }
 0x911   :  { %v5426_v17 = vpop.f32.mrf.mxu0 }
 0x912   :  { %5984 = vtanh.f32 %v982_v16 }
 0x91f   :  { %v5985_v18 = vpop.eup %5984 }
 0x920   :  { %5436 = vmatmul.mubr.msk.f32.vlgmr.msra.gmra.mxu1 %vm141_vm1, %v5985_v18 }
 0x921   :  { %5450 = vmatpush3.msra.mxu1 %v6392_v6  ;;  %5457 = vmatprep.mubr.msk.f32.mxu1 %vm6261_vm0, %v6260_v1 }
 0x922   :  { %5451 = vmatprep.subr.mxu1 %v6260_v1 }
 0x923   :  { %5452 = vmatpush3.msra.mxu1 %v6394_v7 }
 0x924   :  { %5453 = vmatprep.subr.mxu1 %v6260_v1 }
 0x925   :  { %5454 = vmatpush3.msra.mxu1 %v6398_v8 }
 0x926   :  { %5455 = vmatprep.subr.mxu1 %v6260_v1 }
 0x927   :  { %5456 = vmatpush3.msra.mxu1 %v6402_v9 }
 0x928   :  { %5471 = vmatprep.subr.mxu1 %v6260_v1 }
 0x9e0   :  { %v1055_v21 = vpop.f32.mrf.mxu1 }
 0x9e1   :  { %v1056_v23 = vadd.f32 %v6431_v15, %v1055_v21 }
 0x9e2   :  { %v5437_v24 = vpop.f32.mrf.mxu1 }
 0x9e3   :  { %v1060_v26 = vmul.f32 %v1059_v22, %v1056_v23  ;;  %v1062_v27 = vmul.f32 %v1056_v23, %v909_v63 }
 0x9e5   :  { %v1061_v28 = vadd.f32 %v1060_v26, %v908_v25  ;;  %v1063_v29 = vadd.f32 %v1062_v27, %v6519_v57 }
 0x9e7   :  { %5447 = vmatmul.mubr.msk.f32.vlgmr.msra.gmra.mxu0 %vm141_vm1, %v1063_v29 }
 0x9e8   :  { %5461 = vmatpush3.msra.mxu0 %v6354_v0  ;;  %5468 = vmatprep.mubr.msk.f32.mxu0 %vm6261_vm0, %v6260_v1 }
 0x9e9   :  { %5462 = vmatprep.subr.mxu0 %v6260_v1 }
 0x9ea   :  { %5463 = vmatpush3.msra.mxu0 %v6357_v2 }
 0x9eb   :  { %5464 = vmatprep.subr.mxu0 %v6260_v1 }
 0x9ec   :  { %5465 = vmatpush3.msra.mxu0 %v6368_v4 }
 0x9ed   :  { %5466 = vmatprep.subr.mxu0 %v6260_v1 }
 0x9ee   :  { %5467 = vmatpush3.msra.mxu0 %v6374_v5 }
 0x9ef   :  { %5482 = vmatprep.subr.mxu0 %v6260_v1 }
 0xaa7   :  { %v1133_v30 = vpop.f32.mrf.mxu0 }
 0xaa8   :  { %v1134_v31 = vadd.f32 %v6411_v10, %v1133_v30 }
 0xaa9   :  { %v5448_v32 = vpop.f32.mrf.mxu0 }
 0xaaa   :  { %5986 = vtanh.f32 %v1134_v31 }
 0xab7   :  { %v5987_v33 = vpop.eup %5986 }
 0xab8   :  { %5458 = vmatmul.mubr.msk.f32.vlgmr.msra.gmra.mxu1 %vm141_vm1, %v5987_v33 }
 0xab9   :  { %5472 = vmatpush3.msra.mxu1 %v6392_v6  ;;  %5479 = vmatprep.mubr.msk.f32.mxu1 %vm6261_vm0, %v6260_v1 }
 0xaba   :  { %5473 = vmatprep.subr.mxu1 %v6260_v1 }
 0xabb   :  { %5474 = vmatpush3.msra.mxu1 %v6394_v7 }
 0xabc   :  { %5475 = vmatprep.subr.mxu1 %v6260_v1 }
 0xabd   :  { %5476 = vmatpush3.msra.mxu1 %v6398_v8 }
 0xabe   :  { %5477 = vmatprep.subr.mxu1 %v6260_v1 }
 0xabf   :  { %5478 = vmatpush3.msra.mxu1 %v6402_v9 }
 0xac0   :  { %5493 = vmatprep.subr.mxu1 %v6260_v1 }
 0xb78   :  { %v1207_v34 = vpop.f32.mrf.mxu1 }
 0xb79   :  { %v1208_v36 = vadd.f32 %v6431_v15, %v1207_v34 }
 0xb7a   :  { %v5459_v37 = vpop.f32.mrf.mxu1 }
 0xb7b   :  { %v1211_v38 = vmul.f32 %v1208_v36, %v1059_v22  ;;  %v1214_v39 = vmul.f32 %v1213_v35, %v1208_v36 }
 0xb7d   :  { %v1212_v40 = vadd.f32 %v1211_v38, %v1061_v28  ;;  %v1215_v41 = vadd.f32 %v1214_v39, %v6519_v57  ;;  %v1825_v28 = vstv %s6664_s17 }
 0xb7f   :  { %5469 = vmatmul.mubr.msk.f32.vlgmr.msra.gmra.mxu0 %vm141_vm1, %v1215_v41 }
 0xb80   :  { %5483 = vmatpush3.msra.mxu0 %v6354_v0  ;;  %5490 = vmatprep.mubr.msk.f32.mxu0 %vm6261_vm0, %v6260_v1 }
 0xb81   :  { %5484 = vmatprep.subr.mxu0 %v6260_v1 }
 0xb82   :  { %5485 = vmatpush3.msra.mxu0 %v6357_v2 }
 0xb83   :  { %5486 = vmatprep.subr.mxu0 %v6260_v1 }
 0xb84   :  { %5487 = vmatpush3.msra.mxu0 %v6368_v4 }
 0xb85   :  { %5488 = vmatprep.subr.mxu0 %v6260_v1 }
 0xb86   :  { %5489 = vmatpush3.msra.mxu0 %v6374_v5 }
 0xb87   :  { %5504 = vmatprep.subr.mxu0 %v6260_v1 }
 0xc3f   :  { %v1285_v42 = vpop.f32.mrf.mxu0 }
 0xc40   :  { %v1286_v43 = vadd.f32 %v6411_v10, %v1285_v42 }
 0xc41   :  { %v5470_v44 = vpop.f32.mrf.mxu0 }
 0xc42   :  { %5988 = vtanh.f32 %v1286_v43 }
 0xc4f   :  { %v5989_v45 = vpop.eup %5988 }
 0xc50   :  { %5480 = vmatmul.mubr.msk.f32.vlgmr.msra.gmra.mxu1 %vm141_vm1, %v5989_v45 }
 0xc51   :  { %5494 = vmatpush3.msra.mxu1 %v6392_v6  ;;  %5501 = vmatprep.mubr.msk.f32.mxu1 %vm6261_vm0, %v6260_v1 }
 0xc52   :  { %5495 = vmatprep.subr.mxu1 %v6260_v1 }
 0xc53   :  { %5496 = vmatpush3.msra.mxu1 %v6394_v7 }
 0xc54   :  { %5497 = vmatprep.subr.mxu1 %v6260_v1 }
 0xc55   :  { %5498 = vmatpush3.msra.mxu1 %v6398_v8 }
 0xc56   :  { %5499 = vmatprep.subr.mxu1 %v6260_v1 }
 0xc57   :  { %5500 = vmatpush3.msra.mxu1 %v6402_v9 }
 0xc58   :  { %5515 = vmatprep.subr.mxu1 %v6260_v1 }
 0xd10   :  { %v1359_v46 = vpop.f32.mrf.mxu1 }
 0xd11   :  { %v1360_v47 = vadd.f32 %v6431_v15, %v1359_v46 }
 0xd12   :  { %v5481_v48 = vpop.f32.mrf.mxu1 }
 0xd13   :  { %v1363_v49 = vmul.f32 %v1360_v47, %v6576_v19 }
 0xd15   :  { %v6636_v50 = vadd.f32 %v1363_v49, %v1212_v40  ;;  %v2133_v49 = vstv %s1980_s23 }
 0xd17   :  { %1366 = vst.msk [vmem:[#allocation13 + $0x10] sm:$0xff] %vm141_vm1, %v6636_v50  ;;  %5491 = vmatmul.mubr.msk.f32.vlgmr.msra.gmra.mxu0 %vm141_vm1, %v6636_v50 }
 0xd18   :  { %5505 = vmatpush3.msra.mxu0 %v6354_v0  ;;  %5512 = vmatprep.mubr.msk.f32.mxu0 %vm6261_vm0, %v6260_v1 }
 0xd19   :  { %5506 = vmatprep.subr.mxu0 %v6260_v1 }
 0xd1a   :  { %5507 = vmatpush3.msra.mxu0 %v6357_v2 }
 0xd1b   :  { %5508 = vmatprep.subr.mxu0 %v6260_v1 }
 0xd1c   :  { %5509 = vmatpush3.msra.mxu0 %v6368_v4 }
 0xd1d   :  { %5510 = vmatprep.subr.mxu0 %v6260_v1 }
 0xd1e   :  { %5511 = vmatpush3.msra.mxu0 %v6374_v5 }
 0xd1f   :  { %5526 = vmatprep.subr.mxu0 %v6260_v1 }
 0xdd7   :  { %v1440_v51 = vpop.f32.mrf.mxu0 }
 0xdd8   :  { %v1441_v52 = vadd.f32 %v6411_v10, %v1440_v51 }
 0xdd9   :  { %v5492_v53 = vpop.f32.mrf.mxu0 }
 0xdda   :  { %5990 = vtanh.f32 %v1441_v52 }
 0xde7   :  { %v5991_v54 = vpop.eup %5990 }
 0xde8   :  { %5502 = vmatmul.mubr.msk.f32.vlgmr.msra.gmra.mxu1 %vm141_vm1, %v5991_v54 }
 0xde9   :  { %5516 = vmatpush3.msra.mxu1 %v6392_v6  ;;  %5523 = vmatprep.mubr.msk.f32.mxu1 %vm6261_vm0, %v6260_v1 }
 0xdea   :  { %5517 = vmatprep.subr.mxu1 %v6260_v1 }
 0xdeb   :  { %5518 = vmatpush3.msra.mxu1 %v6394_v7 }
 0xdec   :  { %5519 = vmatprep.subr.mxu1 %v6260_v1 }
 0xded   :  { %5520 = vmatpush3.msra.mxu1 %v6398_v8 }
 0xdee   :  { %5521 = vmatprep.subr.mxu1 %v6260_v1 }
 0xdef   :  { %5522 = vmatpush3.msra.mxu1 %v6402_v9 }
 0xdf0   :  { %5537 = vmatprep.subr.mxu1 %v6260_v1 }
 0xea8   :  { %v1514_v55 = vpop.f32.mrf.mxu1 }
 0xea9   :  { %v1515_v57 = vadd.f32 %v6431_v15, %v1514_v55 }
 0xeaa   :  { %v5503_v58 = vpop.f32.mrf.mxu1 }
 0xeab   :  { %v1522_v59 = vmul.f32 %v1521_v56, %v1515_v57  ;;  %v1519_v12 = vmul.f32 %v6693_v11, %v1515_v57  ;;  %v6810_v58 = vstv %s1981_s24 }
 0xead   :  { %v1523_v60 = vadd.f32 %v1522_v59, %v6636_v50  ;;  %v1520_v18 = vadd.f32 %v1519_v12, %v6636_v50 }
 0xeaf   :  { %5513 = vmatmul.mubr.msk.f32.vlgmr.msra.gmra.mxu0 %vm141_vm1, %v1523_v60 }
 0xeb0   :  { %5527 = vmatpush3.msra.mxu0 %v6354_v0  ;;  %5534 = vmatprep.mubr.msk.f32.mxu0 %vm6261_vm0, %v6260_v1 }
 0xeb1   :  { %5528 = vmatprep.subr.mxu0 %v6260_v1 }
 0xeb2   :  { %5529 = vmatpush3.msra.mxu0 %v6357_v2 }
 0xeb3   :  { %5530 = vmatprep.subr.mxu0 %v6260_v1 }
 0xeb4   :  { %5531 = vmatpush3.msra.mxu0 %v6368_v4 }
 0xeb5   :  { %5532 = vmatprep.subr.mxu0 %v6260_v1 }
 0xeb6   :  { %5533 = vmatpush3.msra.mxu0 %v6374_v5 }
 0xeb7   :  { %5548 = vmatprep.subr.mxu0 %v6260_v1 }
 0xf6f   :  { %v1593_v61 = vpop.f32.mrf.mxu0 }
 0xf70   :  { %v1594_v62 = vadd.f32 %v6411_v10, %v1593_v61  ;;  %v2283_v61 = vstv %s6812_s25 }
 0xf71   :  { %v5514_v63 = vpop.f32.mrf.mxu0 }
 0xf72   :  { %5992 = vtanh.f32 %v1594_v62 }
 0xf7f   :  { %v5993_v3 = vpop.eup %5992 }
 0xf80   :  { %5524 = vmatmul.mubr.msk.f32.vlgmr.msra.gmra.mxu1 %vm141_vm1, %v5993_v3 }
 0xf81   :  { %5538 = vmatpush3.msra.mxu1 %v6392_v6  ;;  %5545 = vmatprep.mubr.msk.f32.mxu1 %vm6261_vm0, %v6260_v1 }
 0xf82   :  { %5539 = vmatprep.subr.mxu1 %v6260_v1 }
 0xf83   :  { %5540 = vmatpush3.msra.mxu1 %v6394_v7 }
 0xf84   :  { %5541 = vmatprep.subr.mxu1 %v6260_v1 }
 0xf85   :  { %5542 = vmatpush3.msra.mxu1 %v6398_v8 }
 0xf86   :  { %5543 = vmatprep.subr.mxu1 %v6260_v1 }
 0xf87   :  { %5544 = vmatpush3.msra.mxu1 %v6402_v9 }
 0xf88   :  { %5559 = vmatprep.subr.mxu1 %v6260_v1 }
0x1040   :  { %v1667_v13 = vpop.f32.mrf.mxu1 }
0x1041   :  { %v1668_v16 = vadd.f32 %v6431_v15, %v1667_v13 }
0x1042   :  { %v5525_v17 = vpop.f32.mrf.mxu1 }
0x1043   :  { %v1672_v19 = vmul.f32 %v1671_v14, %v1668_v16  ;;  %v1674_v20 = vmul.f32 %v1668_v16, %v1521_v56 }
0x1045   :  { %v1673_v21 = vadd.f32 %v1672_v19, %v1520_v18  ;;  %v1675_v22 = vadd.f32 %v1674_v20, %v6636_v50 }
0x1047   :  { %5535 = vmatmul.mubr.msk.f32.vlgmr.msra.gmra.mxu0 %vm141_vm1, %v1675_v22  ;;  %v6860_v22 = vld [vmem:[#allocation7] sm:$0xff] }
0x1048   :  { %5549 = vmatpush3.msra.mxu0 %v6354_v0  ;;  %5556 = vmatprep.mubr.msk.f32.mxu0 %vm6261_vm0, %v6260_v1 }
0x1049   :  { %5550 = vmatprep.subr.mxu0 %v6260_v1 }
0x104a   :  { %5551 = vmatpush3.msra.mxu0 %v6357_v2 }
0x104b   :  { %5552 = vmatprep.subr.mxu0 %v6260_v1 }
0x104c   :  { %5553 = vmatpush3.msra.mxu0 %v6368_v4 }
0x104d   :  { %5554 = vmatprep.subr.mxu0 %v6260_v1 }
0x104e   :  { %5555 = vmatpush3.msra.mxu0 %v6374_v5 }
0x104f   :  { %5570 = vmatprep.subr.mxu0 %v6260_v1 }
0x1107   :  { %v1745_v23 = vpop.f32.mrf.mxu0 }
0x1108   :  { %v1746_v24 = vadd.f32 %v6411_v10, %v1745_v23 }
0x1109   :  { %v5536_v25 = vpop.f32.mrf.mxu0 }
0x110a   :  { %5994 = vtanh.f32 %v1746_v24  ;;  %v6867_v24 = vld [vmem:[%s7360_s3] ss:$0 sm:$0xff]  ;;  %s6919_s3 = sld [smem:[#allocation2 + $0x5]] }
0x1110   :  { %s2592_s27 = smul.f32 0.5, %s6919_s3 }
0x1117   :  { %v5995_v26 = vpop.eup %5994 }
0x1118   :  { %5546 = vmatmul.mubr.msk.f32.vlgmr.msra.gmra.mxu1 %vm141_vm1, %v5995_v26 }
0x1119   :  { %5560 = vmatpush3.msra.mxu1 %v6392_v6  ;;  %5567 = vmatprep.mubr.msk.f32.mxu1 %vm6261_vm0, %v6260_v1 }
0x111a   :  { %5561 = vmatprep.subr.mxu1 %v6260_v1 }
0x111b   :  { %5562 = vmatpush3.msra.mxu1 %v6394_v7 }
0x111c   :  { %5563 = vmatprep.subr.mxu1 %v6260_v1 }
0x111d   :  { %5564 = vmatpush3.msra.mxu1 %v6398_v8 }
0x111e   :  { %5565 = vmatprep.subr.mxu1 %v6260_v1 }
0x111f   :  { %5566 = vmatpush3.msra.mxu1 %v6402_v9 }
0x1120   :  { %5581 = vmatprep.subr.mxu1 %v6260_v1 }
0x11d8   :  { %v1819_v27 = vpop.f32.mrf.mxu1 }
0x11d9   :  { %v1820_v29 = vadd.f32 %v6431_v15, %v1819_v27 }
0x11da   :  { %v5547_v30 = vpop.f32.mrf.mxu1 }
0x11db   :  { %v1823_v31 = vmul.f32 %v1820_v29, %v1671_v14  ;;  %v1826_v32 = vmul.f32 %v1825_v28, %v1820_v29  ;;  %v6871_v28 = vld [vmem:[#allocation9 + $0x18] sm:$0xff]  ;;  %v6877_v29 = vld [vmem:[#allocation9 + $0x10] sm:$0xff]  ;;  %v6881_v30 = vld [vmem:[#allocation9 + $0x8] sm:$0xff] }
0x11dd   :  { %v1824_v33 = vadd.f32 %v1823_v31, %v1673_v21  ;;  %v1827_v34 = vadd.f32 %v1826_v32, %v6636_v50  ;;  %v6846_v21 = vld [vmem:[#allocation7 + $0x18] sm:$0xff]  ;;  %v6885_v31 = vld [vmem:[#allocation9] sm:$0xff] }
0x11df   :  { %5557 = vmatmul.mubr.msk.f32.vlgmr.msra.gmra.mxu0 %vm141_vm1, %v1827_v34 }
0x11e0   :  { %5571 = vmatpush3.msra.mxu0 %v6354_v0  ;;  %5578 = vmatprep.mubr.msk.f32.mxu0 %vm6261_vm0, %v6260_v1 }
0x11e1   :  { %5572 = vmatprep.subr.mxu0 %v6260_v1 }
0x11e2   :  { %5573 = vmatpush3.msra.mxu0 %v6357_v2 }
0x11e3   :  { %5574 = vmatprep.subr.mxu0 %v6260_v1 }
0x11e4   :  { %5575 = vmatpush3.msra.mxu0 %v6368_v4 }
0x11e5   :  { %5576 = vmatprep.subr.mxu0 %v6260_v1 }
0x11e6   :  { %5577 = vmatpush3.msra.mxu0 %v6374_v5 }
0x11e7   :  { %5592 = vmatprep.subr.mxu0 %v6260_v1 }
0x129f   :  { %v1897_v35 = vpop.f32.mrf.mxu0 }
0x12a0   :  { %v1898_v36 = vadd.f32 %v6411_v10, %v1897_v35 }
0x12a1   :  { %v5558_v37 = vpop.f32.mrf.mxu0 }
0x12a2   :  { %5996 = vtanh.f32 %v1898_v36 }
0x12af   :  { %v5997_v38 = vpop.eup %5996 }
0x12b0   :  { %5568 = vmatmul.mubr.msk.f32.vlgmr.msra.gmra.mxu1 %vm141_vm1, %v5997_v38 }
0x12b1   :  { %5582 = vmatpush3.msra.mxu1 %v6392_v6  ;;  %5589 = vmatprep.mubr.msk.f32.mxu1 %vm6261_vm0, %v6260_v1 }
0x12b2   :  { %5583 = vmatprep.subr.mxu1 %v6260_v1 }
0x12b3   :  { %5584 = vmatpush3.msra.mxu1 %v6394_v7 }
0x12b4   :  { %5585 = vmatprep.subr.mxu1 %v6260_v1 }
0x12b5   :  { %5586 = vmatpush3.msra.mxu1 %v6398_v8 }
0x12b6   :  { %5587 = vmatprep.subr.mxu1 %v6260_v1 }
0x12b7   :  { %5588 = vmatpush3.msra.mxu1 %v6402_v9 }
0x12b8   :  { %5603 = vmatprep.subr.mxu1 %v6260_v1 }
0x1370   :  { %v1971_v39 = vpop.f32.mrf.mxu1 }
0x1371   :  { %v1972_v40 = vadd.f32 %v6431_v15, %v1971_v39 }
0x1372   :  { %v5569_v41 = vpop.f32.mrf.mxu1 }
0x1373   :  { %v1975_v42 = vmul.f32 %v1972_v40, %v6693_v11  ;;  %v2745_v41 = vstv %s2592_s27 }
0x1375   :  { %v6753_v43 = vadd.f32 %v1975_v42, %v1824_v33  ;;  %v6925_v42 = vld [vmem:[%s7362_s5] ss:$0 sm:$0xff]  ;;  %s2593_s5 = smul.f32 0.16666667, %s6919_s3 }
0x1377   :  { %1978 = vst.msk [vmem:[#allocation13 + $0x18] sm:$0xff] %vm141_vm1, %v6753_v43  ;;  %5579 = vmatmul.mubr.msk.f32.vlgmr.msra.gmra.mxu0 %vm141_vm1, %v6753_v43  ;;  %s6955_s28 = smul.f32 2.0, %s2593_s5 }
0x1378   :  { %5593 = vmatpush3.msra.mxu0 %v6354_v0  ;;  %5600 = vmatprep.mubr.msk.f32.mxu0 %vm6261_vm0, %v6260_v1 }
0x1379   :  { %5594 = vmatprep.subr.mxu0 %v6260_v1 }
0x137a   :  { %5595 = vmatpush3.msra.mxu0 %v6357_v2 }
0x137b   :  { %5596 = vmatprep.subr.mxu0 %v6260_v1 }
0x137c   :  { %5597 = vmatpush3.msra.mxu0 %v6368_v4 }
0x137d   :  { %5598 = vmatprep.subr.mxu0 %v6260_v1 }
0x137e   :  { %5599 = vmatpush3.msra.mxu0 %v6374_v5 }
0x137f   :  { %5614 = vmatprep.subr.mxu0 %v6260_v1 }
0x1437   :  { %v2052_v44 = vpop.f32.mrf.mxu0 }
0x1438   :  { %v2053_v45 = vadd.f32 %v6411_v10, %v2052_v44 }
0x1439   :  { %v5580_v46 = vpop.f32.mrf.mxu0 }
0x143a   :  { %5998 = vtanh.f32 %v2053_v45 }
0x1447   :  { %v5999_v47 = vpop.eup %5998 }
0x1448   :  { %5590 = vmatmul.mubr.msk.f32.vlgmr.msra.gmra.mxu1 %vm141_vm1, %v5999_v47 }
0x1449   :  { %5604 = vmatpush3.msra.mxu1 %v6392_v6  ;;  %5611 = vmatprep.mubr.msk.f32.mxu1 %vm6261_vm0, %v6260_v1 }
0x144a   :  { %5605 = vmatprep.subr.mxu1 %v6260_v1 }
0x144b   :  { %5606 = vmatpush3.msra.mxu1 %v6394_v7 }
0x144c   :  { %5607 = vmatprep.subr.mxu1 %v6260_v1 }
0x144d   :  { %5608 = vmatpush3.msra.mxu1 %v6398_v8 }
0x144e   :  { %5609 = vmatprep.subr.mxu1 %v6260_v1 }
0x144f   :  { %5610 = vmatpush3.msra.mxu1 %v6402_v9 }
0x1450   :  { %5625 = vmatprep.subr.mxu1 %v6260_v1 }
0x1508   :  { %v2126_v48 = vpop.f32.mrf.mxu1 }
0x1509   :  { %v2127_v50 = vadd.f32 %v6431_v15, %v2126_v48 }
0x150a   :  { %v5591_v51 = vpop.f32.mrf.mxu1 }
0x150b   :  { %v2134_v52 = vmul.f32 %v2133_v49, %v2127_v50  ;;  %v2131_v59 = vmul.f32 %v6810_v58, %v2127_v50  ;;  %v6953_v51 = vstv %s2593_s5 }
0x150d   :  { %v2135_v53 = vadd.f32 %v2134_v52, %v6753_v43  ;;  %v2132_v3 = vadd.f32 %v2131_v59, %v6753_v43 }
0x150f   :  { %5601 = vmatmul.mubr.msk.f32.vlgmr.msra.gmra.mxu0 %vm141_vm1, %v2135_v53 }
0x1510   :  { %5615 = vmatpush3.msra.mxu0 %v6354_v0  ;;  %5622 = vmatprep.mubr.msk.f32.mxu0 %vm6261_vm0, %v6260_v1 }
0x1511   :  { %5616 = vmatprep.subr.mxu0 %v6260_v1 }
0x1512   :  { %5617 = vmatpush3.msra.mxu0 %v6357_v2 }
0x1513   :  { %5618 = vmatprep.subr.mxu0 %v6260_v1 }
0x1514   :  { %5619 = vmatpush3.msra.mxu0 %v6368_v4 }
0x1515   :  { %5620 = vmatprep.subr.mxu0 %v6260_v1 }
0x1516   :  { %5621 = vmatpush3.msra.mxu0 %v6374_v5 }
0x1517   :  { %5636 = vmatprep.subr.mxu0 %v6260_v1 }
0x15cf   :  { %v2205_v54 = vpop.f32.mrf.mxu0 }
0x15d0   :  { %v2206_v55 = vadd.f32 %v6411_v10, %v2205_v54  ;;  %v2895_v54 = vstv %s6955_s28 }
0x15d1   :  { %v5602_v56 = vpop.f32.mrf.mxu0 }
0x15d2   :  { %6000 = vtanh.f32 %v2206_v55 }
0x15df   :  { %v6001_v57 = vpop.eup %6000 }
0x15e0   :  { %5612 = vmatmul.mubr.msk.f32.vlgmr.msra.gmra.mxu1 %vm141_vm1, %v6001_v57 }
0x15e1   :  { %5626 = vmatpush3.msra.mxu1 %v6392_v6  ;;  %5633 = vmatprep.mubr.msk.f32.mxu1 %vm6261_vm0, %v6260_v1 }
0x15e2   :  { %5627 = vmatprep.subr.mxu1 %v6260_v1 }
0x15e3   :  { %5628 = vmatpush3.msra.mxu1 %v6394_v7 }
0x15e4   :  { %5629 = vmatprep.subr.mxu1 %v6260_v1 }
0x15e5   :  { %5630 = vmatpush3.msra.mxu1 %v6398_v8 }
0x15e6   :  { %5631 = vmatprep.subr.mxu1 %v6260_v1 }
0x15e7   :  { %5632 = vmatpush3.msra.mxu1 %v6402_v9 }
0x15e8   :  { %5647 = vmatprep.subr.mxu1 %v6260_v1 }
0x16a0   :  { %v2279_v60 = vpop.f32.mrf.mxu1 }
0x16a1   :  { %v2280_v62 = vadd.f32 %v6431_v15, %v2279_v60 }
0x16a2   :  { %v5613_v63 = vpop.f32.mrf.mxu1 }
0x16a3   :  { %v2284_v11 = vmul.f32 %v2283_v61, %v2280_v62  ;;  %v2286_v12 = vmul.f32 %v2280_v62, %v2133_v49 }
0x16a5   :  { %v2285_v13 = vadd.f32 %v2284_v11, %v2132_v3  ;;  %v2287_v14 = vadd.f32 %v2286_v12, %v6753_v43 }
0x16a7   :  { %5623 = vmatmul.mubr.msk.f32.vlgmr.msra.gmra.mxu0 %vm141_vm1, %v2287_v14 }
0x16a8   :  { %5637 = vmatpush3.msra.mxu0 %v6354_v0  ;;  %5644 = vmatprep.mubr.msk.f32.mxu0 %vm6261_vm0, %v6260_v1 }
0x16a9   :  { %5638 = vmatprep.subr.mxu0 %v6260_v1 }
0x16aa   :  { %5639 = vmatpush3.msra.mxu0 %v6357_v2 }
0x16ab   :  { %5640 = vmatprep.subr.mxu0 %v6260_v1 }
0x16ac   :  { %5641 = vmatpush3.msra.mxu0 %v6368_v4  ;;  %v2437_v4 = vstv %s6781_s22 }
0x16ad   :  { %5642 = vmatprep.subr.mxu0 %v6260_v1 }
0x16ae   :  { %5643 = vmatpush3.msra.mxu0 %v6374_v5 }
0x16af   :  { %5658 = vmatprep.subr.mxu0 %v6260_v1 }
0x1767   :  { %v2357_v16 = vpop.f32.mrf.mxu0 }
0x1768   :  { %v2358_v0 = vadd.f32 %v6411_v10, %v2357_v16 }
0x1769   :  { %v5624_v17 = vpop.f32.mrf.mxu0 }
0x176a   :  { %6002 = vtanh.f32 %v2358_v0 }
0x1777   :  { %v6003_v18 = vpop.eup %6002 }
0x1778   :  { %5634 = vmatmul.mubr.msk.f32.vlgmr.msra.gmra.mxu1 %vm141_vm1, %v6003_v18 }
0x1779   :  { %5648 = vmatpush3.msra.mxu1 %v6392_v6  ;;  %5655 = vmatprep.mubr.msk.f32.mxu1 %vm6261_vm0, %v6260_v1 }
0x177a   :  { %5649 = vmatprep.subr.mxu1 %v6260_v1 }
0x177b   :  { %5650 = vmatpush3.msra.mxu1 %v6394_v7 }
0x177c   :  { %5651 = vmatprep.subr.mxu1 %v6260_v1 }
0x177d   :  { %5652 = vmatpush3.msra.mxu1 %v6398_v8  ;;  %v6852_v8 = vld [vmem:[#allocation7 + $0x10] sm:$0xff] }
0x177e   :  { %5653 = vmatprep.subr.mxu1 %v6260_v1 }
0x177f   :  { %5654 = vmatpush3.msra.mxu1 %v6402_v9  ;;  %v6856_v9 = vld [vmem:[#allocation7 + $0x8] sm:$0xff] }
0x1780   :  { %5669 = vmatprep.subr.mxu1 %v6260_v1 }
0x1838   :  { %v2431_v2 = vpop.f32.mrf.mxu1 }
0x1839   :  { %v2432_v5 = vadd.f32 %v6431_v15, %v2431_v2 }
0x183a   :  { %v5635_v6 = vpop.f32.mrf.mxu1 }
0x183b   :  { %v2435_v10 = vmul.f32 %v2432_v5, %v2283_v61  ;;  %v2438_v19 = vmul.f32 %v2437_v4, %v2432_v5 }
0x183d   :  { %v2436_v20 = vadd.f32 %v2435_v10, %v2285_v13  ;;  %v2439_v7 = vadd.f32 %v2438_v19, %v6753_v43  ;;  %v3049_v13 = vstv %s6919_s3 }
0x183f   :  { %5645 = vmatmul.mubr.msk.f32.vlgmr.msra.gmra.mxu0 %vm141_vm1, %v2439_v7 }
0x1840   :  { %5659 = vmatpush3.msra.mxu0 %v6846_v21  ;;  %5666 = vmatprep.mubr.msk.f32.mxu0 %vm6261_vm0, %v6260_v1 }
0x1841   :  { %5660 = vmatprep.subr.mxu0 %v6260_v1 }
0x1842   :  { %5661 = vmatpush3.msra.mxu0 %v6852_v8 }
0x1843   :  { %5662 = vmatprep.subr.mxu0 %v6260_v1 }
0x1844   :  { %5663 = vmatpush3.msra.mxu0 %v6856_v9 }
0x1845   :  { %5664 = vmatprep.subr.mxu0 %v6260_v1 }
0x1846   :  { %5665 = vmatpush3.msra.mxu0 %v6860_v22 }
0x1847   :  { %5680 = vmatprep.subr.mxu0 %v6260_v1 }
0x18ff   :  { %v2509_v23 = vpop.f32.mrf.mxu0 }
0x1900   :  { %v2510_v25 = vadd.f32 %v6867_v24, %v2509_v23 }
0x1901   :  { %v5646_v26 = vpop.f32.mrf.mxu0 }
0x1902   :  { %6004 = vtanh.f32 %v2510_v25 }
0x190f   :  { %v6005_v27 = vpop.eup %6004 }
0x1910   :  { %5656 = vmatmul.mubr.msk.f32.vlgmr.msra.gmra.mxu1 %vm141_vm1, %v6005_v27 }
0x1911   :  { %5670 = vmatpush3.msra.mxu1 %v6871_v28  ;;  %5677 = vmatprep.mubr.msk.f32.mxu1 %vm6261_vm0, %v6260_v1 }
0x1912   :  { %5671 = vmatprep.subr.mxu1 %v6260_v1 }
0x1913   :  { %5672 = vmatpush3.msra.mxu1 %v6877_v29 }
0x1914   :  { %5673 = vmatprep.subr.mxu1 %v6260_v1 }
0x1915   :  { %5674 = vmatpush3.msra.mxu1 %v6881_v30 }
0x1916   :  { %5675 = vmatprep.subr.mxu1 %v6260_v1 }
0x1917   :  { %5676 = vmatpush3.msra.mxu1 %v6885_v31 }
0x1918   :  { %5691 = vmatprep.subr.mxu1 %v6260_v1 }
0x19d0   :  { %v2583_v32 = vpop.f32.mrf.mxu1 }
0x19d1   :  { %v2584_v33 = vadd.f32 %v6431_v15, %v2583_v32 }
0x19d2   :  { %v5657_v34 = vpop.f32.mrf.mxu1 }
0x19d3   :  { %v2587_v35 = vmul.f32 %v2584_v33, %v6810_v58 }
0x19d5   :  { %v6891_v36 = vadd.f32 %v2587_v35, %v2436_v20  ;;  %v3357_v35 = vstv %s3204_s30 }
0x19d7   :  { %2590 = vst.msk [vmem:[#allocation13 + $0x20] sm:$0xff] %vm141_vm1, %v6891_v36  ;;  %5667 = vmatmul.mubr.msk.f32.vlgmr.msra.gmra.mxu0 %vm141_vm1, %v6891_v36 }
0x19d8   :  { %5681 = vmatpush3.msra.mxu0 %v6846_v21  ;;  %5688 = vmatprep.mubr.msk.f32.mxu0 %vm6261_vm0, %v6260_v1 }
0x19d9   :  { %5682 = vmatprep.subr.mxu0 %v6260_v1 }
0x19da   :  { %5683 = vmatpush3.msra.mxu0 %v6852_v8 }
0x19db   :  { %5684 = vmatprep.subr.mxu0 %v6260_v1 }
0x19dc   :  { %5685 = vmatpush3.msra.mxu0 %v6856_v9 }
0x19dd   :  { %5686 = vmatprep.subr.mxu0 %v6260_v1 }
0x19de   :  { %5687 = vmatpush3.msra.mxu0 %v6860_v22 }
0x19df   :  { %5702 = vmatprep.subr.mxu0 %v6260_v1 }
0x1a97   :  { %v2664_v15 = vpop.f32.mrf.mxu0 }
0x1a98   :  { %v2665_v37 = vadd.f32 %v6867_v24, %v2664_v15 }
0x1a99   :  { %v5668_v38 = vpop.f32.mrf.mxu0 }
0x1a9a   :  { %6006 = vtanh.f32 %v2665_v37 }
0x1aa7   :  { %v6007_v39 = vpop.eup %6006 }
0x1aa8   :  { %5678 = vmatmul.mubr.msk.f32.vlgmr.msra.gmra.mxu1 %vm141_vm1, %v6007_v39 }
0x1aa9   :  { %5692 = vmatpush3.msra.mxu1 %v6871_v28  ;;  %5699 = vmatprep.mubr.msk.f32.mxu1 %vm6261_vm0, %v6260_v1 }
0x1aaa   :  { %5693 = vmatprep.subr.mxu1 %v6260_v1 }
0x1aab   :  { %5694 = vmatpush3.msra.mxu1 %v6877_v29 }
0x1aac   :  { %5695 = vmatprep.subr.mxu1 %v6260_v1 }
0x1aad   :  { %5696 = vmatpush3.msra.mxu1 %v6881_v30 }
0x1aae   :  { %5697 = vmatprep.subr.mxu1 %v6260_v1 }
0x1aaf   :  { %5698 = vmatpush3.msra.mxu1 %v6885_v31 }
0x1ab0   :  { %5713 = vmatprep.subr.mxu1 %v6260_v1 }
0x1b68   :  { %v2738_v40 = vpop.f32.mrf.mxu1 }
0x1b69   :  { %v2739_v43 = vadd.f32 %v6925_v42, %v2738_v40 }
0x1b6a   :  { %v5679_v44 = vpop.f32.mrf.mxu1 }
0x1b6b   :  { %v2746_v45 = vmul.f32 %v2745_v41, %v2739_v43  ;;  %v2743_v52 = vmul.f32 %v6953_v51, %v2739_v43  ;;  %v7070_v44 = vstv %s3205_s2 }
0x1b6d   :  { %v2747_v46 = vadd.f32 %v2746_v45, %v6891_v36  ;;  %v2744_v57 = vadd.f32 %v2743_v52, %v6891_v36 }
0x1b6f   :  { %5689 = vmatmul.mubr.msk.f32.vlgmr.msra.gmra.mxu0 %vm141_vm1, %v2747_v46 }
0x1b70   :  { %5703 = vmatpush3.msra.mxu0 %v6846_v21  ;;  %5710 = vmatprep.mubr.msk.f32.mxu0 %vm6261_vm0, %v6260_v1 }
0x1b71   :  { %5704 = vmatprep.subr.mxu0 %v6260_v1 }
0x1b72   :  { %5705 = vmatpush3.msra.mxu0 %v6852_v8 }
0x1b73   :  { %5706 = vmatprep.subr.mxu0 %v6260_v1 }
0x1b74   :  { %5707 = vmatpush3.msra.mxu0 %v6856_v9 }
0x1b75   :  { %5708 = vmatprep.subr.mxu0 %v6260_v1 }
0x1b76   :  { %5709 = vmatpush3.msra.mxu0 %v6860_v22 }
0x1b77   :  { %5724 = vmatprep.subr.mxu0 %v6260_v1 }
0x1c2f   :  { %v2817_v47 = vpop.f32.mrf.mxu0 }
0x1c30   :  { %v2818_v48 = vadd.f32 %v6867_v24, %v2817_v47  ;;  %v3507_v47 = vstv %s7072_s12 }
0x1c31   :  { %v5690_v49 = vpop.f32.mrf.mxu0 }
0x1c32   :  { %6008 = vtanh.f32 %v2818_v48 }
0x1c3f   :  { %v6009_v50 = vpop.eup %6008 }
0x1c40   :  { %5700 = vmatmul.mubr.msk.f32.vlgmr.msra.gmra.mxu1 %vm141_vm1, %v6009_v50 }
0x1c41   :  { %5714 = vmatpush3.msra.mxu1 %v6871_v28  ;;  %5721 = vmatprep.mubr.msk.f32.mxu1 %vm6261_vm0, %v6260_v1 }
0x1c42   :  { %5715 = vmatprep.subr.mxu1 %v6260_v1 }
0x1c43   :  { %5716 = vmatpush3.msra.mxu1 %v6877_v29 }
0x1c44   :  { %5717 = vmatprep.subr.mxu1 %v6260_v1 }
0x1c45   :  { %5718 = vmatpush3.msra.mxu1 %v6881_v30 }
0x1c46   :  { %5719 = vmatprep.subr.mxu1 %v6260_v1 }
0x1c47   :  { %5720 = vmatpush3.msra.mxu1 %v6885_v31 }
0x1c48   :  { %5735 = vmatprep.subr.mxu1 %v6260_v1 }
0x1d00   :  { %v2891_v53 = vpop.f32.mrf.mxu1 }
0x1d01   :  { %v2892_v55 = vadd.f32 %v6925_v42, %v2891_v53 }
0x1d02   :  { %v5701_v56 = vpop.f32.mrf.mxu1 }
0x1d03   :  { %v2896_v58 = vmul.f32 %v2895_v54, %v2892_v55  ;;  %v2898_v59 = vmul.f32 %v2892_v55, %v2745_v41 }
0x1d05   :  { %v2897_v60 = vadd.f32 %v2896_v58, %v2744_v57  ;;  %v2899_v61 = vadd.f32 %v2898_v59, %v6891_v36 }
0x1d07   :  { %5711 = vmatmul.mubr.msk.f32.vlgmr.msra.gmra.mxu0 %vm141_vm1, %v2899_v61 }
0x1d08   :  { %5725 = vmatpush3.msra.mxu0 %v6846_v21  ;;  %5732 = vmatprep.mubr.msk.f32.mxu0 %vm6261_vm0, %v6260_v1 }
0x1d09   :  { %5726 = vmatprep.subr.mxu0 %v6260_v1 }
0x1d0a   :  { %5727 = vmatpush3.msra.mxu0 %v6852_v8 }
0x1d0b   :  { %5728 = vmatprep.subr.mxu0 %v6260_v1 }
0x1d0c   :  { %5729 = vmatpush3.msra.mxu0 %v6856_v9 }
0x1d0d   :  { %5730 = vmatprep.subr.mxu0 %v6260_v1 }
0x1d0e   :  { %5731 = vmatpush3.msra.mxu0 %v6860_v22 }
0x1d0f   :  { %5746 = vmatprep.subr.mxu0 %v6260_v1 }
0x1dc7   :  { %v2969_v62 = vpop.f32.mrf.mxu0 }
0x1dc8   :  { %v2970_v63 = vadd.f32 %v6867_v24, %v2969_v62 }
0x1dc9   :  { %v5712_v3 = vpop.f32.mrf.mxu0 }
0x1dca   :  { %6010 = vtanh.f32 %v2970_v63 }
0x1dd7   :  { %v6011_v11 = vpop.eup %6010 }
0x1dd8   :  { %5722 = vmatmul.mubr.msk.f32.vlgmr.msra.gmra.mxu1 %vm141_vm1, %v6011_v11 }
0x1dd9   :  { %5736 = vmatpush3.msra.mxu1 %v6871_v28  ;;  %5743 = vmatprep.mubr.msk.f32.mxu1 %vm6261_vm0, %v6260_v1 }
0x1dda   :  { %5737 = vmatprep.subr.mxu1 %v6260_v1 }
0x1ddb   :  { %5738 = vmatpush3.msra.mxu1 %v6877_v29 }
0x1ddc   :  { %5739 = vmatprep.subr.mxu1 %v6260_v1 }
0x1ddd   :  { %5740 = vmatpush3.msra.mxu1 %v6881_v30 }
0x1dde   :  { %5741 = vmatprep.subr.mxu1 %v6260_v1 }
0x1ddf   :  { %5742 = vmatpush3.msra.mxu1 %v6885_v31 }
0x1de0   :  { %5757 = vmatprep.subr.mxu1 %v6260_v1 }
0x1e98   :  { %v3043_v12 = vpop.f32.mrf.mxu1 }
0x1e99   :  { %v3044_v14 = vadd.f32 %v6925_v42, %v3043_v12 }
0x1e9a   :  { %v5723_v16 = vpop.f32.mrf.mxu1 }
0x1e9b   :  { %v3047_v0 = vmul.f32 %v3044_v14, %v2895_v54  ;;  %v3050_v17 = vmul.f32 %v3049_v13, %v3044_v14 }
0x1e9d   :  { %v3048_v18 = vadd.f32 %v3047_v0, %v2897_v60  ;;  %v3051_v2 = vadd.f32 %v3050_v17, %v6891_v36  ;;  %v3661_v60 = vstv %s7041_s29 }
0x1e9f   :  { %5733 = vmatmul.mubr.msk.f32.vlgmr.msra.gmra.mxu0 %vm141_vm1, %v3051_v2 }
0x1ea0   :  { %5747 = vmatpush3.msra.mxu0 %v6846_v21  ;;  %5754 = vmatprep.mubr.msk.f32.mxu0 %vm6261_vm0, %v6260_v1 }
0x1ea1   :  { %5748 = vmatprep.subr.mxu0 %v6260_v1 }
0x1ea2   :  { %5749 = vmatpush3.msra.mxu0 %v6852_v8 }
0x1ea3   :  { %5750 = vmatprep.subr.mxu0 %v6260_v1 }
0x1ea4   :  { %5751 = vmatpush3.msra.mxu0 %v6856_v9 }
0x1ea5   :  { %5752 = vmatprep.subr.mxu0 %v6260_v1 }
0x1ea6   :  { %5753 = vmatpush3.msra.mxu0 %v6860_v22 }
0x1ea7   :  { %5768 = vmatprep.subr.mxu0 %v6260_v1 }
0x1f5f   :  { %v3121_v4 = vpop.f32.mrf.mxu0 }
0x1f60   :  { %v3122_v5 = vadd.f32 %v6867_v24, %v3121_v4 }
0x1f61   :  { %v5734_v6 = vpop.f32.mrf.mxu0 }
0x1f62   :  { %6012 = vtanh.f32 %v3122_v5 }
0x1f6f   :  { %v6013_v10 = vpop.eup %6012 }
0x1f70   :  { %5744 = vmatmul.mubr.msk.f32.vlgmr.msra.gmra.mxu1 %vm141_vm1, %v6013_v10 }
0x1f71   :  { %5758 = vmatpush3.msra.mxu1 %v6871_v28  ;;  %5765 = vmatprep.mubr.msk.f32.mxu1 %vm6261_vm0, %v6260_v1 }
0x1f72   :  { %5759 = vmatprep.subr.mxu1 %v6260_v1 }
0x1f73   :  { %5760 = vmatpush3.msra.mxu1 %v6877_v29 }
0x1f74   :  { %5761 = vmatprep.subr.mxu1 %v6260_v1 }
0x1f75   :  { %5762 = vmatpush3.msra.mxu1 %v6881_v30 }
0x1f76   :  { %5763 = vmatprep.subr.mxu1 %v6260_v1 }
0x1f77   :  { %5764 = vmatpush3.msra.mxu1 %v6885_v31 }
0x1f78   :  { %5779 = vmatprep.subr.mxu1 %v6260_v1 }
0x2030   :  { %v3195_v19 = vpop.f32.mrf.mxu1 }
0x2031   :  { %v3196_v20 = vadd.f32 %v6925_v42, %v3195_v19 }
0x2032   :  { %v5745_v7 = vpop.f32.mrf.mxu1 }
0x2033   :  { %v3199_v23 = vmul.f32 %v3196_v20, %v6953_v51 }
0x2035   :  { %v7013_v25 = vadd.f32 %v3199_v23, %v3048_v18  ;;  %v3969_v23 = vstv %s3816_s13 }
0x2037   :  { %3202 = vst.msk [vmem:[#allocation13 + $0x28] sm:$0xff] %vm141_vm1, %v7013_v25  ;;  %5755 = vmatmul.mubr.msk.f32.vlgmr.msra.gmra.mxu0 %vm141_vm1, %v7013_v25 }
0x2038   :  { %5769 = vmatpush3.msra.mxu0 %v6846_v21  ;;  %5776 = vmatprep.mubr.msk.f32.mxu0 %vm6261_vm0, %v6260_v1 }
0x2039   :  { %5770 = vmatprep.subr.mxu0 %v6260_v1 }
0x203a   :  { %5771 = vmatpush3.msra.mxu0 %v6852_v8 }
0x203b   :  { %5772 = vmatprep.subr.mxu0 %v6260_v1 }
0x203c   :  { %5773 = vmatpush3.msra.mxu0 %v6856_v9 }
0x203d   :  { %5774 = vmatprep.subr.mxu0 %v6260_v1 }
0x203e   :  { %5775 = vmatpush3.msra.mxu0 %v6860_v22 }
0x203f   :  { %5790 = vmatprep.subr.mxu0 %v6260_v1 }
0x20f7   :  { %v3276_v26 = vpop.f32.mrf.mxu0 }
0x20f8   :  { %v3277_v27 = vadd.f32 %v6867_v24, %v3276_v26 }
0x20f9   :  { %v5756_v32 = vpop.f32.mrf.mxu0 }
0x20fa   :  { %6014 = vtanh.f32 %v3277_v27 }
0x2107   :  { %v6015_v33 = vpop.eup %6014 }
0x2108   :  { %5766 = vmatmul.mubr.msk.f32.vlgmr.msra.gmra.mxu1 %vm141_vm1, %v6015_v33 }
0x2109   :  { %5780 = vmatpush3.msra.mxu1 %v6871_v28  ;;  %5787 = vmatprep.mubr.msk.f32.mxu1 %vm6261_vm0, %v6260_v1 }
0x210a   :  { %5781 = vmatprep.subr.mxu1 %v6260_v1 }
0x210b   :  { %5782 = vmatpush3.msra.mxu1 %v6877_v29 }
0x210c   :  { %5783 = vmatprep.subr.mxu1 %v6260_v1 }
0x210d   :  { %5784 = vmatpush3.msra.mxu1 %v6881_v30 }
0x210e   :  { %5785 = vmatprep.subr.mxu1 %v6260_v1 }
0x210f   :  { %5786 = vmatpush3.msra.mxu1 %v6885_v31 }
0x2110   :  { %5801 = vmatprep.subr.mxu1 %v6260_v1 }
0x21c8   :  { %v3350_v34 = vpop.f32.mrf.mxu1 }
0x21c9   :  { %v3351_v36 = vadd.f32 %v6925_v42, %v3350_v34 }
0x21ca   :  { %v5767_v15 = vpop.f32.mrf.mxu1 }
0x21cb   :  { %v3358_v37 = vmul.f32 %v3357_v35, %v3351_v36  ;;  %v3355_v45 = vmul.f32 %v7070_v44, %v3351_v36  ;;  %v7187_v15 = vstv %s3817_s14 }
0x21cd   :  { %v3359_v38 = vadd.f32 %v3358_v37, %v7013_v25  ;;  %v3356_v50 = vadd.f32 %v3355_v45, %v7013_v25 }
0x21cf   :  { %5777 = vmatmul.mubr.msk.f32.vlgmr.msra.gmra.mxu0 %vm141_vm1, %v3359_v38 }
0x21d0   :  { %5791 = vmatpush3.msra.mxu0 %v6846_v21  ;;  %5798 = vmatprep.mubr.msk.f32.mxu0 %vm6261_vm0, %v6260_v1 }
0x21d1   :  { %5792 = vmatprep.subr.mxu0 %v6260_v1 }
0x21d2   :  { %5793 = vmatpush3.msra.mxu0 %v6852_v8 }
0x21d3   :  { %5794 = vmatprep.subr.mxu0 %v6260_v1 }
0x21d4   :  { %5795 = vmatpush3.msra.mxu0 %v6856_v9 }
0x21d5   :  { %5796 = vmatprep.subr.mxu0 %v6260_v1 }
0x21d6   :  { %5797 = vmatpush3.msra.mxu0 %v6860_v22 }
0x21d7   :  { %5812 = vmatprep.subr.mxu0 %v6260_v1 }
0x228f   :  { %v3429_v39 = vpop.f32.mrf.mxu0 }
0x2290   :  { %v3430_v40 = vadd.f32 %v6867_v24, %v3429_v39  ;;  %v4119_v39 = vstv %s7189_s15 }
0x2291   :  { %v5778_v41 = vpop.f32.mrf.mxu0 }
0x2292   :  { %6016 = vtanh.f32 %v3430_v40 }
0x229f   :  { %v6017_v43 = vpop.eup %6016 }
0x22a0   :  { %5788 = vmatmul.mubr.msk.f32.vlgmr.msra.gmra.mxu1 %vm141_vm1, %v6017_v43 }
0x22a1   :  { %5802 = vmatpush3.msra.mxu1 %v6871_v28  ;;  %5809 = vmatprep.mubr.msk.f32.mxu1 %vm6261_vm0, %v6260_v1 }
0x22a2   :  { %5803 = vmatprep.subr.mxu1 %v6260_v1 }
0x22a3   :  { %5804 = vmatpush3.msra.mxu1 %v6877_v29 }
0x22a4   :  { %5805 = vmatprep.subr.mxu1 %v6260_v1 }
0x22a5   :  { %5806 = vmatpush3.msra.mxu1 %v6881_v30 }
0x22a6   :  { %5807 = vmatprep.subr.mxu1 %v6260_v1 }
0x22a7   :  { %5808 = vmatpush3.msra.mxu1 %v6885_v31 }
0x22a8   :  { %5823 = vmatprep.subr.mxu1 %v6260_v1 }
0x2360   :  { %v3503_v46 = vpop.f32.mrf.mxu1 }
0x2361   :  { %v3504_v48 = vadd.f32 %v6925_v42, %v3503_v46 }
0x2362   :  { %v5789_v49 = vpop.f32.mrf.mxu1 }
0x2363   :  { %v3508_v51 = vmul.f32 %v3507_v47, %v3504_v48  ;;  %v3510_v52 = vmul.f32 %v3504_v48, %v3357_v35 }
0x2365   :  { %v3509_v53 = vadd.f32 %v3508_v51, %v3356_v50  ;;  %v3511_v54 = vadd.f32 %v3510_v52, %v7013_v25 }
0x2367   :  { %5799 = vmatmul.mubr.msk.f32.vlgmr.msra.gmra.mxu0 %vm141_vm1, %v3511_v54 }
0x2368   :  { %5813 = vmatpush3.msra.mxu0 %v6846_v21  ;;  %5820 = vmatprep.mubr.msk.f32.mxu0 %vm6261_vm0, %v6260_v1 }
0x2369   :  { %5814 = vmatprep.subr.mxu0 %v6260_v1 }
0x236a   :  { %5815 = vmatpush3.msra.mxu0 %v6852_v8 }
0x236b   :  { %5816 = vmatprep.subr.mxu0 %v6260_v1 }
0x236c   :  { %5817 = vmatpush3.msra.mxu0 %v6856_v9 }
0x236d   :  { %5818 = vmatprep.subr.mxu0 %v6260_v1 }
0x236e   :  { %5819 = vmatpush3.msra.mxu0 %v6860_v22 }
0x236f   :  { %5834 = vmatprep.subr.mxu0 %v6260_v1 }
0x2427   :  { %v3581_v55 = vpop.f32.mrf.mxu0 }
0x2428   :  { %v3582_v56 = vadd.f32 %v6867_v24, %v3581_v55  ;;  %v4427_v55 = vld [vmem:[#allocation13] sm:$0xff] }
0x2429   :  { %v5800_v57 = vpop.f32.mrf.mxu0 }
0x242a   :  { %6018 = vtanh.f32 %v3582_v56  ;;  %v4437_v56 = vld [vmem:[#allocation10 + $0x10] sm:$0xff] }
0x242b   :  { %v4429_v57 = vld [vmem:[#allocation13 + $0x10] sm:$0xff] }
0x2437   :  { %v6019_v58 = vpop.eup %6018 }
0x2438   :  { %5810 = vmatmul.mubr.msk.f32.vlgmr.msra.gmra.mxu1 %vm141_vm1, %v6019_v58  ;;  %v4430_v58 = vld [vmem:[#allocation13 + $0x18] sm:$0xff] }
0x2439   :  { %5824 = vmatpush3.msra.mxu1 %v6871_v28  ;;  %5831 = vmatprep.mubr.msk.f32.mxu1 %vm6261_vm0, %v6260_v1 }
0x243a   :  { %5825 = vmatprep.subr.mxu1 %v6260_v1 }
0x243b   :  { %5826 = vmatpush3.msra.mxu1 %v6877_v29 }
0x243c   :  { %5827 = vmatprep.subr.mxu1 %v6260_v1 }
0x243d   :  { %5828 = vmatpush3.msra.mxu1 %v6881_v30 }
0x243e   :  { %5829 = vmatprep.subr.mxu1 %v6260_v1 }
0x243f   :  { %5830 = vmatpush3.msra.mxu1 %v6885_v31 }
0x2440   :  { %5845 = vmatprep.subr.mxu1 %v6260_v1 }
0x24f8   :  { %v3655_v59 = vpop.f32.mrf.mxu1 }
0x24f9   :  { %v3656_v61 = vadd.f32 %v6925_v42, %v3655_v59  ;;  %v4431_v59 = vld [vmem:[#allocation13 + $0x20] sm:$0xff] }
0x24fa   :  { %v5811_v62 = vpop.f32.mrf.mxu1 }
0x24fb   :  { %v3659_v63 = vmul.f32 %v3656_v61, %v3507_v47  ;;  %v3662_v3 = vmul.f32 %v3661_v60, %v3656_v61  ;;  %v4432_v60 = vld [vmem:[#allocation13 + $0x28] sm:$0xff]  ;;  %v4586_v62 = vld [vmem:[#allocation12 + $0x18] sm:$0xff] }
0x24fd   :  { %v3660_v11 = vadd.f32 %v3659_v63, %v3509_v53  ;;  %v3663_v12 = vadd.f32 %v3662_v3, %v7013_v25 }
0x24ff   :  { %5821 = vmatmul.mubr.msk.f32.vlgmr.msra.gmra.mxu0 %vm141_vm1, %v3663_v12  ;;  %v7234_v12 = vld [vmem:[%s7364_s7] ss:$0 sm:$0xff] }
0x2500   :  { %5835 = vmatpush3.msra.mxu0 %v6846_v21  ;;  %5842 = vmatprep.mubr.msk.f32.mxu0 %vm6261_vm0, %v6260_v1 }
0x2501   :  { %5836 = vmatprep.subr.mxu0 %v6260_v1 }
0x2502   :  { %5837 = vmatpush3.msra.mxu0 %v6852_v8 }
0x2503   :  { %5838 = vmatprep.subr.mxu0 %v6260_v1 }
0x2504   :  { %5839 = vmatpush3.msra.mxu0 %v6856_v9 }
0x2505   :  { %5840 = vmatprep.subr.mxu0 %v6260_v1 }
0x2506   :  { %5841 = vmatpush3.msra.mxu0 %v6860_v22 }
0x2507   :  { %5856 = vmatprep.subr.mxu0 %v6260_v1 }
0x25bf   :  { %v3733_v13 = vpop.f32.mrf.mxu0 }
0x25c0   :  { %v3734_v14 = vadd.f32 %v6867_v24, %v3733_v13 }
0x25c1   :  { %v5822_v16 = vpop.f32.mrf.mxu0 }
0x25c2   :  { %6020 = vtanh.f32 %v3734_v14 }
0x25cf   :  { %v6021_v0 = vpop.eup %6020 }
0x25d0   :  { %5832 = vmatmul.mubr.msk.f32.vlgmr.msra.gmra.mxu1 %vm141_vm1, %v6021_v0 }
0x25d1   :  { %5846 = vmatpush3.msra.mxu1 %v6871_v28  ;;  %5853 = vmatprep.mubr.msk.f32.mxu1 %vm6261_vm0, %v6260_v1 }
0x25d2   :  { %5847 = vmatprep.subr.mxu1 %v6260_v1 }
0x25d3   :  { %5848 = vmatpush3.msra.mxu1 %v6877_v29 }
0x25d4   :  { %5849 = vmatprep.subr.mxu1 %v6260_v1 }
0x25d5   :  { %5850 = vmatpush3.msra.mxu1 %v6881_v30 }
0x25d6   :  { %5851 = vmatprep.subr.mxu1 %v6260_v1 }
0x25d7   :  { %5852 = vmatpush3.msra.mxu1 %v6885_v31 }
0x25d8   :  { %5867 = vmatprep.subr.mxu1 %v6260_v1 }
0x2690   :  { %v3807_v17 = vpop.f32.mrf.mxu1 }
0x2691   :  { %v3808_v18 = vadd.f32 %v6925_v42, %v3807_v17 }
0x2692   :  { %v5833_v2 = vpop.f32.mrf.mxu1 }
0x2693   :  { %v3811_v4 = vmul.f32 %v3808_v18, %v7070_v44 }
0x2695   :  { %v7130_v5 = vadd.f32 %v3811_v4, %v3660_v11 }
0x2697   :  { %3814 = vst.msk [vmem:[#allocation13 + $0x30] sm:$0xff] %vm141_vm1, %v7130_v5  ;;  %5843 = vmatmul.mubr.msk.f32.vlgmr.msra.gmra.mxu0 %vm141_vm1, %v7130_v5 }
0x2698   :  { %5857 = vmatpush3.msra.mxu0 %v6846_v21  ;;  %5864 = vmatprep.mubr.msk.f32.mxu0 %vm6261_vm0, %v6260_v1 }
0x2699   :  { %5858 = vmatprep.subr.mxu0 %v6260_v1 }
0x269a   :  { %5859 = vmatpush3.msra.mxu0 %v6852_v8 }
0x269b   :  { %5860 = vmatprep.subr.mxu0 %v6260_v1 }
0x269c   :  { %5861 = vmatpush3.msra.mxu0 %v6856_v9 }
0x269d   :  { %5862 = vmatprep.subr.mxu0 %v6260_v1 }
0x269e   :  { %5863 = vmatpush3.msra.mxu0 %v6860_v22  ;;  %v4433_v61 = vld [vmem:[#allocation13 + $0x30] sm:$0xff] }
0x269f   :  { %5878 = vmatprep.subr.mxu0 %v6260_v1 }
0x2757   :  { %v3888_v6 = vpop.f32.mrf.mxu0 }
0x2758   :  { %v3889_v10 = vadd.f32 %v6867_v24, %v3888_v6  ;;  %v4585_v6 = vld [vmem:[#allocation12 + $0x10] sm:$0xff] }
0x2759   :  { %v5844_v19 = vpop.f32.mrf.mxu0 }
0x275a   :  { %6022 = vtanh.f32 %v3889_v10 }
0x2767   :  { %v6023_v20 = vpop.eup %6022 }
0x2768   :  { %5854 = vmatmul.mubr.msk.f32.vlgmr.msra.gmra.mxu1 %vm141_vm1, %v6023_v20  ;;  %v4584_v20 = vld [vmem:[#allocation12 + $0x8] sm:$0xff] }
0x2769   :  { %5868 = vmatpush3.msra.mxu1 %v6871_v28  ;;  %5875 = vmatprep.mubr.msk.f32.mxu1 %vm6261_vm0, %v6260_v1 }
0x276a   :  { %5869 = vmatprep.subr.mxu1 %v6260_v1 }
0x276b   :  { %5870 = vmatpush3.msra.mxu1 %v6877_v29 }
0x276c   :  { %5871 = vmatprep.subr.mxu1 %v6260_v1 }
0x276d   :  { %5872 = vmatpush3.msra.mxu1 %v6881_v30 }
0x276e   :  { %5873 = vmatprep.subr.mxu1 %v6260_v1 }
0x276f   :  { %5874 = vmatpush3.msra.mxu1 %v6885_v31 }
0x2770   :  { %5889 = vmatprep.subr.mxu1 %v6260_v1 }
0x2828   :  { %v3962_v7 = vpop.f32.mrf.mxu1 }
0x2829   :  { %v3963_v25 = vadd.f32 %v6925_v42, %v3962_v7 }
0x282a   :  { %v5855_v26 = vpop.f32.mrf.mxu1 }
0x282b   :  { %v3970_v27 = vmul.f32 %v3969_v23, %v3963_v25  ;;  %v3967_v37 = vmul.f32 %v7187_v15, %v3963_v25 }
0x282d   :  { %v3971_v32 = vadd.f32 %v3970_v27, %v7130_v5  ;;  %v3968_v43 = vadd.f32 %v3967_v37, %v7130_v5 }
0x282f   :  { %5865 = vmatmul.mubr.msk.f32.vlgmr.msra.gmra.mxu0 %vm141_vm1, %v3971_v32 }
0x2830   :  { %5879 = vmatpush3.msra.mxu0 %v6846_v21  ;;  %5886 = vmatprep.mubr.msk.f32.mxu0 %vm6261_vm0, %v6260_v1 }
0x2831   :  { %5880 = vmatprep.subr.mxu0 %v6260_v1 }
0x2832   :  { %5881 = vmatpush3.msra.mxu0 %v6852_v8 }
0x2833   :  { %5882 = vmatprep.subr.mxu0 %v6260_v1 }
0x2834   :  { %5883 = vmatpush3.msra.mxu0 %v6856_v9 }
0x2835   :  { %5884 = vmatprep.subr.mxu0 %v6260_v1 }
0x2836   :  { %5885 = vmatpush3.msra.mxu0 %v6860_v22 }
0x2837   :  { %5900 = vmatprep.subr.mxu0 %v6260_v1 }
0x28ef   :  { %v4041_v33 = vpop.f32.mrf.mxu0 }
0x28f0   :  { %v4042_v34 = vadd.f32 %v6867_v24, %v4041_v33 }
0x28f1   :  { %v5866_v35 = vpop.f32.mrf.mxu0 }
0x28f2   :  { %6024 = vtanh.f32 %v4042_v34 }
0x28ff   :  { %v6025_v36 = vpop.eup %6024 }
0x2900   :  { %5876 = vmatmul.mubr.msk.f32.vlgmr.msra.gmra.mxu1 %vm141_vm1, %v6025_v36 }
0x2901   :  { %5890 = vmatpush3.msra.mxu1 %v6871_v28  ;;  %5897 = vmatprep.mubr.msk.f32.mxu1 %vm6261_vm0, %v6260_v1 }
0x2902   :  { %5891 = vmatprep.subr.mxu1 %v6260_v1 }
0x2903   :  { %5892 = vmatpush3.msra.mxu1 %v6877_v29 }
0x2904   :  { %5893 = vmatprep.subr.mxu1 %v6260_v1 }
0x2905   :  { %5894 = vmatpush3.msra.mxu1 %v6881_v30 }
0x2906   :  { %5895 = vmatprep.subr.mxu1 %v6260_v1 }
0x2907   :  { %5896 = vmatpush3.msra.mxu1 %v6885_v31 }
0x2908   :  { %5911 = vmatprep.subr.mxu1 %v6260_v1 }
0x29c0   :  { %v4115_v38 = vpop.f32.mrf.mxu1 }
0x29c1   :  { %v4116_v40 = vadd.f32 %v6925_v42, %v4115_v38 }
0x29c2   :  { %v5877_v41 = vpop.f32.mrf.mxu1 }
0x29c3   :  { %v4120_v44 = vmul.f32 %v4119_v39, %v4116_v40  ;;  %v4122_v45 = vmul.f32 %v4116_v40, %v3969_v23  ;;  %v4583_v23 = vld [vmem:[#allocation12] sm:$0xff]  ;;  %v7256_v40 = vld [vmem:[%s7366_s9] ss:$0 sm:$0xff]  ;;  %s6262_s9 = smov [#allocation13]  }
0x29c4   :  { %s4888_s18 = sshll.u32 %s6262_s9, 4  ;;  %s4889_s18 = int_to_ptr.vmem [resolvable:$true] %s4888_s18 }
0x29c5   :  { %v4121_v46 = vadd.f32 %v4120_v44, %v3968_v43  ;;  %v4123_v47 = vadd.f32 %v4122_v45, %v7130_v5  ;;  %s6200_s19 = scalar_lea.vmem %s4889_s18, 1024  ;;  %p6205_p3 = scmp.lt.s32.totalorder %s4889_s18, %s4889_s18 }
0x29c6   :  { %p6201_p2 = scmp.ne.s32.totalorder %s4889_s18, %s6200_s19  ;;  %p6206_p4 = scmp.lt.s32.totalorder %s6200_s19, %s6200_s19 }
0x29c7   :  { %5887 = vmatmul.mubr.msk.f32.vlgmr.msra.gmra.mxu0 %vm141_vm1, %v4123_v47 }
0x29c8   :  { %5901 = vmatpush3.msra.mxu0 %v6846_v21  ;;  %5908 = vmatprep.mubr.msk.f32.mxu0 %vm6261_vm0, %v6260_v1  ;;  %p6207_p5 = por %p6206_p4, %p6205_p3 }
0x29c9   :  { %5902 = vmatprep.subr.mxu0 %v6260_v1 }
0x29ca   :  { %5903 = vmatpush3.msra.mxu0 %v6852_v8  ;;  %v4438_v8 = vld [vmem:[#allocation10 + $0x18] sm:$0xff]  ;;  %p6208_p6 = pnand %p6207_p5, %p6201_p2 }
0x29cb   :  { %5904 = vmatprep.subr.mxu0 %v6260_v1 }
0x29cc   :  { %5905 = vmatpush3.msra.mxu0 %v6856_v9 }
0x29cd   :  { %5906 = vmatprep.subr.mxu0 %v6260_v1 }
0x29ce   :  { %5907 = vmatpush3.msra.mxu0 %v6860_v22  ;;  %v4273_v22 = vstv %s7158_s0 }
0x29cf   :  { %5922 = vmatprep.subr.mxu0 %v4438_v8 }
0x2a87   :  { %v4193_v48 = vpop.f32.mrf.mxu0 }
0x2a88   :  { %v4194_v49 = vadd.f32 %v6867_v24, %v4193_v48 }
0x2a89   :  { %v5888_v21 = vpop.f32.mrf.mxu0 }
0x2a8a   :  { %6026 = vtanh.f32 %v4194_v49 }
0x2a97   :  { %v6027_v50 = vpop.eup %6026 }
0x2a98   :  { %5898 = vmatmul.mubr.msk.f32.vlgmr.msra.gmra.mxu1 %vm141_vm1, %v6027_v50 }
0x2a99   :  { %5912 = vmatpush3.msra.mxu1 %v6871_v28  ;;  %5919 = vmatprep.mubr.msk.f32.mxu1 %vm6261_vm0, %v6260_v1 }
0x2a9a   :  { %5913 = vmatprep.subr.mxu1 %v6260_v1 }
0x2a9b   :  { %5914 = vmatpush3.msra.mxu1 %v6877_v29 }
0x2a9c   :  { %5915 = vmatprep.subr.mxu1 %v6260_v1 }
0x2a9d   :  { %5916 = vmatpush3.msra.mxu1 %v6881_v30  ;;  %v4435_v30 = vld [vmem:[#allocation10] sm:$0xff] }
0x2a9e   :  { %5917 = vmatprep.subr.mxu1 %v6260_v1  ;;  %v4436_v1 = vld [vmem:[#allocation10 + $0x8] sm:$0xff] }
0x2a9f   :  { %5918 = vmatpush3.msra.mxu1 %v6885_v31  ;;  %v4428_v31 = vld [vmem:[#allocation13 + $0x8] sm:$0xff] }
0x2aa0   :  { %5942 = vmatprep.subr.mxu1 %v4586_v62 }
0x2b58   :  { %v4267_v9 = vpop.f32.mrf.mxu1 }
0x2b59   :  { %v4268_v28 = vadd.f32 %v6925_v42, %v4267_v9 }
0x2b5a   :  { %v5899_v51 = vpop.f32.mrf.mxu1 }
0x2b5b   :  { %v4271_v52 = vmul.f32 %v4268_v28, %v4119_v39  ;;  %v4274_v53 = vmul.f32 %v4273_v22, %v4268_v28 }
0x2b5d   :  { %v7219_v54 = vadd.f32 %v4271_v52, %v4121_v46  ;;  %v4275_v29 = vadd.f32 %v4274_v53, %v7130_v5 }
0x2b5f   :  { %5909 = vmatmul.mubr.msk.f32.vlgmr.msra.gmra.mxu0 %vm141_vm1, %v4275_v29 }
0x2b60   :  { %5923 = vmatpush3.msra.mxu0 %v4438_v8  ;;  %5930 = vmatprep.mubr.msk.f32.mxu0 %vm141_vm1, %v4427_v55 }
0x2b61   :  { %5924 = vmatprep.subr.mxu0 %v4437_v56 }
0x2b62   :  { %5925 = vmatpush3.msra.mxu0 %v4437_v56 }
0x2b63   :  { %5926 = vmatprep.subr.mxu0 %v4436_v1 }
0x2b64   :  { %5927 = vmatpush3.msra.mxu0 %v4436_v1 }
0x2b65   :  { %5928 = vmatprep.subr.mxu0 %v4435_v30 }
0x2b66   :  { %5929 = vmatpush3.msra.mxu0 %v4435_v30 }
0x2b67   :  { %5931 = vmatmul.mubr.msk.f32.vlgmr.msra.gmra.mxu0 %vm141_vm1, %v4428_v31 }
0x2b68   :  { %5933 = vmatprep.mubr.msk.f32.mxu0 %vm141_vm1, %v4429_v57 }
0x2b6b   :  { %5934 = vmatmul.mubr.msk.f32.gmra.mxu0 %vm141_vm1, %v4430_v58 }
0x2b6c   :  { %5936 = vmatprep.mubr.msk.f32.mxu0 %vm141_vm1, %v4431_v59 }
0x2b6f   :  { %5937 = vmatmul.mubr.msk.f32.gmra.mxu0 %vm141_vm1, %v4432_v60 }
0x2b70   :  { %5939 = vmatprep.mubr.msk.f32.mxu0 %vm141_vm1, %v4433_v61 }
0x2c1f   :  { %v4345_v63 = vpop.f32.mrf.mxu0 }
0x2c20   :  { %v4346_v3 = vadd.f32 %v6867_v24, %v4345_v63 }
0x2c21   :  { %v5910_v11 = vpop.f32.mrf.mxu0 }
0x2c22   :  { %6028 = vtanh.f32 %v4346_v3 }
0x2c27   :  { %v5932_v13 = vpop.f32.mrf.mxu0 }
0x2c28   :  { %v4542_v14 = vadd.f32 %v5932_v13, %v7234_v12 }
0x2c29   :  { %v4536_v16 = vpop.f32.mrf.mxu0 }
0x2c2a   :  { %v4537_v0 = vadd.f32 %v7234_v12, %v4536_v16 }
0x2c2b   :  { %v5935_v17 = vpop.f32.mrf.mxu0 }
0x2c2c   :  { %6030 = vtanh.f32 %v4537_v0  ;;  %v4552_v18 = vadd.f32 %v5935_v17, %v7234_v12 }
0x2c2d   :  { %6032 = vtanh.f32 %v4542_v14  ;;  %v4546_v2 = vpop.f32.mrf.mxu0 }
0x2c2e   :  { %v4547_v24 = vadd.f32 %v7234_v12, %v4546_v2 }
0x2c2f   :  { %v6029_v4 = vpop.eup %6028  ;;  %v5938_v5 = vpop.f32.mrf.mxu0 }
0x2c30   :  { %6034 = vtanh.f32 %v4547_v24  ;;  %5920 = vmatmul.mubr.msk.f32.vlgmr.msra.gmra.mxu1 %vm141_vm1, %v6029_v4  ;;  %v4562_v10 = vadd.f32 %v5938_v5, %v7234_v12 }
0x2c31   :  { %6036 = vtanh.f32 %v4552_v18  ;;  %v4556_v19 = vpop.f32.mrf.mxu0  ;;  %5943 = vmatpush3.msra.mxu1 %v4586_v62 }
0x2c32   :  { %v4557_v7 = vadd.f32 %v7234_v12, %v4556_v19  ;;  %5944 = vmatprep.subr.mxu1 %v4585_v6 }
0x2c33   :  { %5945 = vmatpush3.msra.mxu1 %v4585_v6 }
0x2c34   :  { %6038 = vtanh.f32 %v4557_v7  ;;  %5946 = vmatprep.subr.mxu1 %v4584_v20 }
0x2c35   :  { %6040 = vtanh.f32 %v4562_v10  ;;  %5947 = vmatpush3.msra.mxu1 %v4584_v20 }
0x2c36   :  { %5948 = vmatprep.subr.mxu1 %v4583_v23 }
0x2c37   :  { %5949 = vmatpush3.msra.mxu1 %v4583_v23 }
0x2c39   :  { %v6031_v25 = vpop.eup %6030 }
0x2c3a   :  { %v6033_v26 = vpop.eup %6032  ;;  %5950 = vmatprep.mubr.msk.f32.mxu1 %vm141_vm1, %v6031_v25 }
0x2c3b   :  { %5951 = vmatmul.mubr.msk.f32.vlgmr.msra.gmra.mxu1 %vm141_vm1, %v6033_v26 }
0x2c3d   :  { %v6035_v27 = vpop.eup %6034 }
0x2c3e   :  { %v6037_v32 = vpop.eup %6036  ;;  %5953 = vmatprep.mubr.msk.f32.mxu1 %vm141_vm1, %v6035_v27 }
0x2c3f   :  { %5954 = vmatmul.mubr.msk.f32.gmra.mxu1 %vm141_vm1, %v6037_v32 }
0x2c41   :  { %v6039_v33 = vpop.eup %6038 }
0x2c42   :  { %v6041_v34 = vpop.eup %6040  ;;  %5956 = vmatprep.mubr.msk.f32.mxu1 %vm141_vm1, %v6039_v33 }
0x2c43   :  { %5957 = vmatmul.mubr.msk.f32.gmra.mxu1 %vm141_vm1, %v6041_v34 }
0x2cf0   :  { %v4419_v35 = vpop.f32.mrf.mxu1 }
0x2cf1   :  { %v4420_v36 = vadd.f32 %v6925_v42, %v4419_v35 }
0x2cf2   :  { %v5921_v37 = vpop.f32.mrf.mxu1 }
0x2cf3   :  { %v4423_v38 = vmul.f32 %v4420_v36, %v7187_v15 }
0x2cf5   :  { %v4424_v39 = vadd.f32 %v4423_v38, %v7219_v54 }
0x2cf7   :  { %4426 = vst.msk [vmem:[#allocation13 + $0x38] sm:$0xff] %vm141_vm1, %v4424_v39 }
0x2cfb   :  { %v5952_v41 = vpop.f32.mrf.mxu1 }
0x2cfc   :  { %v7259_v43 = vadd.f32 %v5952_v41, %v7256_v40 }
0x2cfd   :  { %v4684_v44 = vpop.f32.mrf.mxu1 }
0x2cfe   :  { %v4748_v45 = vand.u32 2147483647, %v7259_v43  ;;  %v7263_v42 = vadd.f32 %v7256_v40, %v4684_v44  ;;  %v4434_v15 = vld [vmem:[#allocation13 + $0x38] sm:$0xff]  ;;  %v4724_v25 = vmax.f32 %v7259_v43, 0.0  ;;  %vm4732_vm2 = vcmp.ne.f32.partialorder %v7259_v43, %v7259_v43 }
0x2cff   :  { %v5955_v46 = vpop.f32.mrf.mxu1  ;;  %5940 = vmatmul.mubr.msk.f32.gmra.mxu0 %vm141_vm1, %v4434_v15 }
0x2d00   :  { %v4756_v47 = vsub.f32 0.0, %v4748_v45  ;;  %v4747_v48 = vand.u32 2147483647, %v7263_v42  ;;  %v7268_v49 = vadd.f32 %v5955_v46, %v7256_v40  ;;  %v4723_v33 = vmax.f32 %v7263_v42, 0.0 }
0x2d01   :  { %v4694_v21 = vpop.f32.mrf.mxu1  ;;  %vm4731_vm4 = vcmp.ne.f32.partialorder %v7263_v42, %v7263_v42 }
0x2d02   :  { %v4765_v50 = vmul.f32 1.442695, %v4756_v47  ;;  %v4755_v8 = vsub.f32 0.0, %v4747_v48  ;;  %v7271_v9 = vadd.f32 %v7256_v40, %v4694_v21  ;;  %v4750_v22 = vand.u32 2147483647, %v7268_v49 }
0x2d03   :  { %v5958_v28 = vpop.f32.mrf.mxu1  ;;  %v4726_v15 = vmax.f32 %v7268_v49, 0.0  ;;  %vm4734_vm8 = vcmp.ne.f32.partialorder %v7268_v49, %v7268_v49 }
0x2d04   :  { %6042 = vpow2.f32 %v4765_v50  ;;  %v4763_v51 = vmul.f32 1.442695, %v4755_v8  ;;  %v4758_v52 = vsub.f32 0.0, %v4750_v22  ;;  %v4749_v53 = vand.u32 2147483647, %v7271_v9 }
0x2d05   :  { %v7276_v54 = vadd.f32 %v5958_v28, %v7256_v40  ;;  %v4704_v29 = vpop.f32.mrf.mxu1  ;;  %v4725_v50 = vmax.f32 %v7271_v9, 0.0  ;;  %vm4733_vm9 = vcmp.ne.f32.partialorder %v7271_v9, %v7271_v9 }
0x2d06   :  { %6044 = vpow2.f32 %v4763_v51  ;;  %v7279_v55 = vadd.f32 %v7256_v40, %v4704_v29  ;;  %v4769_v56 = vmul.f32 1.442695, %v4758_v52  ;;  %v4757_v1 = vsub.f32 0.0, %v4749_v53 }
0x2d07   :  { %v4752_v30 = vand.u32 2147483647, %v7276_v54  ;;  %vm4736_vm12 = vcmp.ne.f32.partialorder %v7276_v54, %v7276_v54 }
0x2d08   :  { %v4751_v31 = vand.u32 2147483647, %v7279_v55  ;;  %6046 = vpow2.f32 %v4769_v56  ;;  %v4767_v57 = vmul.f32 1.442695, %v4757_v1  ;;  %vm4735_vm13 = vcmp.ne.f32.partialorder %v7279_v55, %v7279_v55 }
0x2d09   :  { %v4760_v58 = vsub.f32 0.0, %v4752_v30 }
0x2d0a   :  { %v4759_v59 = vsub.f32 0.0, %v4751_v31  ;;  %6048 = vpow2.f32 %v4767_v57 }
0x2d0b   :  { %v4773_v60 = vmul.f32 1.442695, %v4760_v58 }
0x2d0c   :  { %v4771_v61 = vmul.f32 1.442695, %v4759_v59 }
0x2d0d   :  { %6050 = vpow2.f32 %v4773_v60 }
0x2d0e   :  { %6052 = vpow2.f32 %v4771_v61 }
0x2d11   :  { %v6043_v62 = vpop.eup %6042 }
0x2d12   :  { %v4788_v63 = vadd.f32 1.0, %v6043_v62  ;;  %v4791_v17 = vmul.f32 -0.5, %v6043_v62  ;;  %v4794_v10 = vand.u32 2147483647, %v6043_v62 }
0x2d13   :  { %v6045_v3 = vpop.eup %6044 }
0x2d14   :  { %6054 = vlog2.f32 %v4788_v63  ;;  %v4779_v11 = vadd.f32 1.0, %v6045_v3  ;;  %v4782_v2 = vmul.f32 -0.5, %v6045_v3  ;;  %v4792_v6 = vadd.f32 1.0, %v4791_v17 }
0x2d15   :  { %v6047_v13 = vpop.eup %6046  ;;  %v4785_v26 = vand.u32 2147483647, %v6045_v3  ;;  %vm4795_vm3 = vcmp.lt.f32.partialorder %v4794_v10, 0.0004427343  ;;  %v4728_v63 = vmax.f32 %v7276_v54, 0.0 }
0x2d16   :  { %6056 = vlog2.f32 %v4779_v11  ;;  %v4806_v14 = vadd.f32 1.0, %v6047_v13  ;;  %v4783_v19 = vadd.f32 1.0, %v4782_v2  ;;  %v4809_v20 = vmul.f32 -0.5, %v6047_v13 }
0x2d17   :  { %v6049_v16 = vpop.eup %6048  ;;  %v4793_v32 = vmul.f32 %v6043_v62, %v4792_v6  ;;  %v4812_v34 = vand.u32 2147483647, %v6047_v13  ;;  %vm4786_vm5 = vcmp.lt.f32.partialorder %v4785_v26, 0.0004427343  ;;  %v4727_v6 = vmax.f32 %v7279_v55, 0.0 }
0x2d18   :  { %6058 = vlog2.f32 %v4806_v14  ;;  %v4797_v0 = vadd.f32 1.0, %v6049_v16  ;;  %v4800_v7 = vmul.f32 -0.5, %v6049_v16  ;;  %v4784_v36 = vmul.f32 %v6045_v3, %v4783_v19 }
0x2d19   :  { %v4810_v37 = vadd.f32 1.0, %v4809_v20  ;;  %vm7298_vm6 = vcmp.lt.f32.partialorder %v4812_v34, 0.0004427343  ;;  %v4803_v8 = vand.u32 2147483647, %v6049_v16 }
0x2d1a   :  { %v7283_v18 = vpop.eup %6050  ;;  %6060 = vlog2.f32 %v4797_v0  ;;  %v4801_v41 = vadd.f32 1.0, %v4800_v7 }
0x2d1b   :  { %v7285_v24 = vpop.eup %6052  ;;  %v4824_v4 = vadd.f32 1.0, %v7283_v18  ;;  %v4827_v44 = vmul.f32 -0.5, %v7283_v18  ;;  %v4811_v52 = vmul.f32 %v6047_v13, %v4810_v37  ;;  %v4830_v30 = vand.u32 2147483647, %v7283_v18 }
0x2d1c   :  { %v4815_v5 = vadd.f32 1.0, %v7285_v24  ;;  %v4818_v46 = vmul.f32 -0.5, %v7285_v24  ;;  %v4802_v56 = vmul.f32 %v6049_v16, %v4801_v41  ;;  %vm4804_vm7 = vcmp.lt.f32.partialorder %v4803_v8, 0.0004427343 }
0x2d1d   :  { %6062 = vlog2.f32 %v4824_v4  ;;  %v4828_v1 = vadd.f32 1.0, %v4827_v44  ;;  %v4821_v61 = vand.u32 2147483647, %v7285_v24  ;;  %vm4831_vm10 = vcmp.lt.f32.partialorder %v4830_v30, 0.0004427343 }
0x2d1e   :  { %6064 = vlog2.f32 %v4815_v5  ;;  %v4819_v59 = vadd.f32 1.0, %v4818_v46 }
0x2d1f   :  { %v4829_v16 = vmul.f32 %v7283_v18, %v4828_v1  ;;  %vm4822_vm11 = vcmp.lt.f32.partialorder %v4821_v61, 0.0004427343 }
0x2d20   :  { %v4820_v2 = vmul.f32 %v7285_v24, %v4819_v59 }
0x2d21   :  { %v6055_v23 = vpop.eup %6054 }
0x2d22   :  { %v4790_v27 = vmul.f32 0.6931472, %v6055_v23 }
0x2d23   :  { %v6057_v35 = vpop.eup %6056 }
0x2d24   :  { %v4796_v38 = vsel %vm4795_vm3, %v4793_v32, %v4790_v27  ;;  %v4781_v39 = vmul.f32 0.6931472, %v6057_v35 }
0x2d25   :  { %v4852_v45 = vadd.f32 %v4796_v38, %v4724_v25  ;;  %v6059_v47 = vpop.eup %6058 }
0x2d26   :  { %v4787_v48 = vsel %vm4786_vm5, %v4784_v36, %v4781_v39  ;;  %v4808_v51 = vmul.f32 0.6931472, %v6059_v47 }
0x2d27   :  { %v4860_v22 = vsel %vm4732_vm2, %v7259_v43, %v4852_v45  ;;  %v4851_v28 = vadd.f32 %v4787_v48, %v4723_v33  ;;  %v6061_v53 = vpop.eup %6060 }
0x2d28   :  { %v4868_v29 = vadd.f32 1e-06, %v4860_v22  ;;  %v4814_v57 = vsel %vm7298_vm6, %v4811_v52, %v4808_v51  ;;  %v4799_v58 = vmul.f32 0.6931472, %v6061_v53 }
0x2d29   :  { %v4859_v31 = vsel %vm4731_vm4, %v7263_v42, %v4851_v28  ;;  %v4854_v60 = vadd.f32 %v4814_v57, %v4726_v15 }
0x2d2a   :  { %4876 = vst.msk [vmem:[#allocation14 + $0x8] sm:$0xff] %vm141_vm1, %v4868_v29  ;;  %v4867_v43 = vadd.f32 1e-06, %v4859_v31  ;;  %v6063_v62 = vpop.eup %6062  ;;  %v4805_v42 = vsel %vm4804_vm7, %v4802_v56, %v4799_v58 }
0x2d2b   :  { %v6065_v3 = vpop.eup %6064  ;;  %v4862_v11 = vsel %vm4734_vm8, %v7268_v49, %v4854_v60  ;;  %v4853_v13 = vadd.f32 %v4805_v42, %v4725_v50  ;;  %v4826_v14 = vmul.f32 0.6931472, %v6063_v62 }
0x2d2c   :  { %4875 = vst.msk [vmem:[#allocation14] sm:$0xff] %vm141_vm1, %v4867_v43  ;;  %v4870_v0 = vadd.f32 1e-06, %v4862_v11  ;;  %v4817_v17 = vmul.f32 0.6931472, %v6065_v3 }
0x2d2d   :  { %v4861_v4 = vsel %vm4733_vm9, %v7271_v9, %v4853_v13  ;;  %v4832_v5 = vsel %vm4831_vm10, %v4829_v16, %v4826_v14 }
0x2d2e   :  { %4878 = vst.msk [vmem:[#allocation14 + $0x18] sm:$0xff] %vm141_vm1, %v4870_v0  ;;  %v4869_v10 = vadd.f32 1e-06, %v4861_v4  ;;  %v4856_v19 = vadd.f32 %v4832_v5, %v4728_v63  ;;  %v4823_v49 = vsel %vm4822_vm11, %v4820_v2, %v4817_v17 }
0x2d2f   :  { %v4855_v18 = vadd.f32 %v4823_v49, %v4727_v6 }
0x2d30   :  { %4877 = vst.msk [vmem:[#allocation14 + $0x10] sm:$0xff] %vm141_vm1, %v4869_v10  ;;  %v4864_v20 = vsel %vm4736_vm12, %v7276_v54, %v4856_v19 }
0x2d31   :  { %v4872_v9 = vadd.f32 1e-06, %v4864_v20  ;;  %v4863_v24 = vsel %vm4735_vm13, %v7279_v55, %v4855_v18 }
0x2d32   :  { %v4871_v7 = vadd.f32 1e-06, %v4863_v24 }
0x2d33   :  { %4880 = vst.msk [vmem:[#allocation14 + $0x28] sm:$0xff] %vm141_vm1, %v4872_v9 }
0x2d34   :  { %4879 = vst.msk [vmem:[#allocation14 + $0x20] sm:$0xff] %vm141_vm1, %v4871_v7 }
0x2dbf   :  { %v5941_v23 = vpop.f32.mrf.mxu0 }
0x2dc0   :  { %v4572_v25 = vadd.f32 %v5941_v23, %v7234_v12 }
0x2dc1   :  { %v4566_v26 = vpop.f32.mrf.mxu0 }
0x2dc2   :  { %v4567_v27 = vadd.f32 %v7234_v12, %v4566_v26 }
0x2dc4   :  { %6066 = vtanh.f32 %v4567_v27 }
0x2dc5   :  { %6068 = vtanh.f32 %v4572_v25 }
0x2dd1   :  { %v6067_v54 = vpop.eup %6066 }
0x2dd2   :  { %v6069_v32 = vpop.eup %6068  ;;  %5959 = vmatprep.mubr.msk.f32.mxu1 %vm141_vm1, %v6067_v54 }
0x2dd3   :  { %5960 = vmatmul.mubr.msk.f32.gmra.mxu1 %vm141_vm1, %v6069_v32 }
0x2dd4   :  { %6211 = shalt.err (!%p6208_p6)
}
0x2dd5   :  { %4894 = dma.vmem_to_hbm [thread:$0]  %s4889_s18, 1024, %s7367_s10, [#allocation4], %s6253_s20, %s6253_s20, %s6254_s21  }
0x2dd6   :  { %s6263_s10 = smov [#allocation14]  }
0x2dd7   :  { %s4900_s24 = sshll.u32 %s6263_s10, 4  ;;  %s4901_s24 = int_to_ptr.vmem [resolvable:$true] %s4900_s24 }
0x2dd8   :  { %s6220_s25 = scalar_lea.vmem %s4901_s24, 1024  ;;  %p6225_p8 = scmp.lt.s32.totalorder %s4901_s24, %s4901_s24 }
0x2dd9   :  { %p6221_p7 = scmp.ne.s32.totalorder %s4901_s24, %s6220_s25  ;;  %p6226_p9 = scmp.lt.s32.totalorder %s6220_s25, %s6220_s25 }
0x2ddb   :  { %p6227_p10 = por %p6226_p9, %p6225_p8 }
0x2ddd   :  { %p6228_p11 = pnand %p6227_p10, %p6221_p7 }
0x2e93   :  { %v5961_v12 = vpop.f32.mrf.mxu1 }
0x2e94   :  { %v4720_v55 = vadd.f32 %v5961_v12, %v7256_v40 }
0x2e95   :  { %v4714_v33 = vpop.f32.mrf.mxu1 }
0x2e96   :  { %v4754_v34 = vand.u32 2147483647, %v4720_v55  ;;  %v4715_v35 = vadd.f32 %v7256_v40, %v4714_v33  ;;  %v4730_v53 = vmax.f32 %v4720_v55, 0.0  ;;  %vm4738_vm0 = vcmp.ne.f32.partialorder %v4720_v55, %v4720_v55 }
0x2e98   :  { %v4762_v36 = vsub.f32 0.0, %v4754_v34  ;;  %v4753_v37 = vand.u32 2147483647, %v4715_v35  ;;  %v4729_v31 = vmax.f32 %v4715_v35, 0.0  ;;  %vm4737_vm2 = vcmp.ne.f32.partialorder %v4715_v35, %v4715_v35 }
0x2e9a   :  { %v4777_v38 = vmul.f32 1.442695, %v4762_v36  ;;  %v4761_v39 = vsub.f32 0.0, %v4753_v37 }
0x2e9c   :  { %6070 = vpow2.f32 %v4777_v38  ;;  %v4775_v41 = vmul.f32 1.442695, %v4761_v39 }
0x2e9e   :  { %6072 = vpow2.f32 %v4775_v41 }
0x2ea9   :  { %v6071_v44 = vpop.eup %6070 }
0x2eaa   :  { %v4842_v45 = vadd.f32 1.0, %v6071_v44  ;;  %v4845_v47 = vmul.f32 -0.5, %v6071_v44  ;;  %v4848_v50 = vand.u32 2147483647, %v6071_v44 }
0x2eab   :  { %v6073_v15 = vpop.eup %6072 }
0x2eac   :  { %6074 = vlog2.f32 %v4842_v45  ;;  %v4833_v46 = vadd.f32 1.0, %v6073_v15  ;;  %v4836_v48 = vmul.f32 -0.5, %v6073_v15  ;;  %v4846_v21 = vadd.f32 1.0, %v4845_v47 }
0x2ead   :  { %v4839_v40 = vand.u32 2147483647, %v6073_v15  ;;  %vm4849_vm14 = vcmp.lt.f32.partialorder %v4848_v50, 0.0004427343 }
0x2eae   :  { %6076 = vlog2.f32 %v4833_v46  ;;  %v4837_v8 = vadd.f32 1.0, %v4836_v48  ;;  %v4847_v51 = vmul.f32 %v6071_v44, %v4846_v21 }
0x2eaf   :  { %vm4840_vm15 = vcmp.lt.f32.partialorder %v4839_v40, 0.0004427343 }
0x2eb0   :  { %v4838_v1 = vmul.f32 %v6073_v15, %v4837_v8 }
0x2eb9   :  { %v6075_v22 = vpop.eup %6074 }
0x2eba   :  { %v4844_v28 = vmul.f32 0.6931472, %v6075_v22 }
0x2ebb   :  { %v6077_v52 = vpop.eup %6076 }
0x2ebc   :  { %v4850_v29 = vsel %vm4849_vm14, %v4847_v51, %v4844_v28  ;;  %v4835_v56 = vmul.f32 0.6931472, %v6077_v52 }
0x2ebd   :  { %v4858_v30 = vadd.f32 %v4850_v29, %v4730_v53 }
0x2ebe   :  { %v4841_v57 = vsel %vm4840_vm15, %v4838_v1, %v4835_v56 }
0x2ebf   :  { %v4866_v58 = vsel %vm4738_vm0, %v4720_v55, %v4858_v30  ;;  %v4857_v59 = vadd.f32 %v4841_v57, %v4729_v31 }
0x2ec0   :  { %v4874_v43 = vadd.f32 1e-06, %v4866_v58 }
0x2ec1   :  { %v4865_v60 = vsel %vm4737_vm2, %v4715_v35, %v4857_v59 }
0x2ec2   :  { %4882 = vst.msk [vmem:[#allocation14 + $0x38] sm:$0xff] %vm141_vm1, %v4874_v43  ;;  %v4873_v61 = vadd.f32 1e-06, %v4865_v60 }
0x2ec4   :  { %4881 = vst.msk [vmem:[#allocation14 + $0x30] sm:$0xff] %vm141_vm1, %v4873_v61 }
0x2ec5   :  { %6231 = shalt.err (!%p6228_p11)
}
0x2ec6   :  { %4906 = dma.vmem_to_hbm [thread:$0]  %s4901_s24, 1024, %s7368_s11, [#allocation15], %s6253_s20, %s6253_s20, %s6254_s21  }
0x2ec7   :  { %6248 = dma.done.wait [#allocation4], 1024  }
0x2ec8   :  { %6249 = vsyncadd [#allocation4], 4294966272 }
0x2ec9   :  { %6250 = dma.done.wait [#allocation15], 1024  }
0x2eca   :  { %6251 = vsyncadd [#allocation15], 4294966272 }
0x2ecb   :  { %4913 = vsyncpa [#allocation3], 1 }
0x2ecc   :  { %4914 = vsyncpa [#allocation8], 1 }
0x2ecd   :  { %4915 = vsyncpa [#allocation11], 1 }
0x2ece   :  { %4916 = vsyncpa [#allocation4], 1 }
0x2ecf   :  { %4917 = vsyncpa [#allocation15], 1 }
0x2ed0   :  { %4918 = vsyncpa [#allocation5], 1 }

</bundles_post_ra>
